<compile_context>
chip_gen: v6e
topology: v6e:2x2x1
jax: 0.10.0
libtpu: 0.0.40
codegen_flags: <defaults>
</compile_context>

<pallas_src>
import functools

import jax
import jax.numpy as jnp
from jax.experimental import pallas as pl
from jax.experimental.pallas import tpu as pltpu


_VMEM_LIMIT_BYTES = 32 * 1024 * 1024   # > v5e's 16 MiB default, <= v7x's 64 MiB physical


# ----------------------------------------------------------------------------- helpers
def _round128(n):
    return ((n + 127) // 128) * 128


def _pad_axis(a, axis, new_size):
    pad = [(0, 0)] * a.ndim
    pad[axis] = (0, new_size - a.shape[axis])
    return jnp.pad(a, pad)


def _layer_norm(v, gamma, beta, n_real, eps=1e-5):
    """LayerNorm over the first `n_real` lanes of a zero-padded (rows, Cp) slab.

    Padded lanes of `v` are zero, so sum/n_real and sum(v*v)/n_real are exact; gamma/beta
    are zero-padded so the padded lanes of the output stay exactly zero.
    """
    inv_n = 1.0 / n_real
    mu = jnp.sum(v, axis=-1, keepdims=True) * inv_n
    var = jnp.sum(v * v, axis=-1, keepdims=True) * inv_n - mu * mu
    return (v - mu) * jax.lax.rsqrt(var + eps) * gamma + beta


def _rows_per_step(total_rows, seq, target_rows=512):
    """Rows per grid step (multiple of seq).  Aim for ~512-row MXU M blocks; at toy sizes
    this is a single grid step covering all rows."""
    batch = total_rows // seq
    bb = max(1, min(batch, max(1, target_rows // seq)))
    while batch % bb:
        bb -= 1
    return bb * seq


# ----------------------------------------------------------------------------- Block kernel
def _block_kernel(x_ref,                         # (Mb, Cp) f32, lanes >= C are zero
                  bias_ref,                      # (T, T) f32 additive causal bias (0 / -1e30)
                  wqkv_ref,                      # (Cp, 3C) bf16  [q | k | v], head-major cols
                  wph_ref,                       # (H, hs, Cp) bf16  projection, split per head
                  bp_ref,                        # (1, Cp) f32
                  w1_ref, b1_ref,                # (Cp, Fp) bf16, (1, Fp) f32
                  w2_ref, b2_ref,                # (Fp, Cp) bf16, (1, Cp) f32
                  g1_ref, be1_ref,               # (1, Cp) f32  LN1 (zero-padded)
                  g2_ref, be2_ref,               # (1, Cp) f32  LN2 (zero-padded)
                  o_ref,                         # (Mb, Cp) f32  lane-dense output
                  *, n_heads, seq_len, n_embd):
    mb, _ = x_ref.shape
    bb = mb // seq_len                           # batch elements in this row block
    C, H = n_embd, n_heads
    hs = C // H
    x = x_ref[...]                               # residual stream (padded lanes are zero)

    # ---------------- attention: LN1 -> one fused QKV matmul -> all-head batched attention --
    h1 = _layer_norm(x, g1_ref[...], be1_ref[...], C)
    qkv = jnp.dot(h1.astype(jnp.bfloat16), wqkv_ref[...],
                  preferred_element_type=jnp.float32)               # (Mb, 3C) f32 accumulate

    def heads_to_batch(z):                       # (Mb, C) -> (H*bb, T, hs), head-major batch
        return jnp.concatenate(
            [z[:, h * hs:(h + 1) * hs].reshape(bb, seq_len, hs) for h in range(H)], axis=0)

    q = heads_to_batch(qkv[:, 0:C]).astype(jnp.bfloat16)
    k = heads_to_batch(qkv[:, C:2 * C]).astype(jnp.bfloat16)
    v = heads_to_batch(qkv[:, 2 * C:3 * C]).astype(jnp.bfloat16)

    scale = C ** (-0.5)                          # NOTE: reference scales by n_embd, not head_size
    s = jnp.einsum("btd,bsd->bts", q, k,
                   preferred_element_type=jnp.float32) * scale      # (H*bb, T, T) f32
    s = s + bias_ref[...]                        # additive causal bias, broadcast over batch
    s = s - jnp.max(s, axis=-1, keepdims=True)
    p = jnp.exp(s)
    p = p * pl.reciprocal(jnp.sum(p, axis=-1, keepdims=True), approx=True)
    # TODO(synk): attention dropout is identity (eval mode)
    ctx = jnp.einsum("bts,bsd->btd", p.astype(jnp.bfloat16), v,
                     preferred_element_type=jnp.float32)            # (H*bb, T, hs) f32

    # per-head projection: sum_h ctx_h @ Wp_h == concat_h(ctx_h) @ Wp  (no lane concat needed)
    ctx_h = ctx.reshape(H, mb, hs).astype(jnp.bfloat16)
    attn = jnp.einsum("hmd,hdc->hmc", ctx_h, wph_ref[...],
                      preferred_element_type=jnp.float32).sum(axis=0) + bp_ref[...]
    # TODO(synk): projection dropout is identity (eval mode)
    x1 = x + attn                                # residual 1 (padded lanes stay zero)

    # ---------------- MLP: LN2 -> Linear -> ReLU -> Linear -----------------------------------
    h2 = _layer_norm(x1, g2_ref[...], be2_ref[...], C)
    f = jnp.dot(h2.astype(jnp.bfloat16), w1_ref[...],
                preferred_element_type=jnp.float32) + b1_ref[...]
    f = jnp.maximum(f, 0.0)
    f = jnp.dot(f.astype(jnp.bfloat16), w2_ref[...],
                preferred_element_type=jnp.float32) + b2_ref[...]
    # TODO(synk): FFN dropout is identity (eval mode)
    o_ref[...] = x1 + f                          # residual 2, lane-dense (Mb, Cp) store


def transformer_block(x2d, bias, blk, *, n_heads, seq_len, n_embd):
    """x2d: (B*T, Cp) f32 padded residual stream.  bias: (T, T) additive causal bias."""
    rows, Cp = x2d.shape
    mb = _rows_per_step(rows, seq_len)
    weights = (bias, blk["wqkv"], blk["wp_heads"], blk["bp"],
               blk["w1"], blk["b1"], blk["w2"], blk["b2"],
               blk["g1"], blk["be1"], blk["g2"], blk["be2"])
    full = lambda a: pl.BlockSpec(a.shape, lambda i: (0,) * a.ndim)

    return pl.pallas_call(
        functools.partial(_block_kernel, n_heads=n_heads, seq_len=seq_len, n_embd=n_embd),
        out_shape=jax.ShapeDtypeStruct((rows, Cp), jnp.float32),
        grid_spec=pltpu.PrefetchScalarGridSpec(
            num_scalar_prefetch=0,
            grid=(rows // mb,),
            in_specs=[pl.BlockSpec((mb, Cp), lambda i: (i, 0))]
                     + [full(a) for a in weights],
            out_specs=pl.BlockSpec((mb, Cp), lambda i: (i, 0)),
        ),
        compiler_params=pltpu.CompilerParams(
            dimension_semantics=("parallel",),
            vmem_limit_bytes=_VMEM_LIMIT_BYTES),
    )(x2d, *weights)


# ----------------------------------------------------------------------------- final LN + lm_head
def _lm_head_kernel(x_ref, g_ref, b_ref, w_ref, bias_ref, o_ref, *, n_embd):
    h = _layer_norm(x_ref[...], g_ref[...], b_ref[...], n_embd)
    o_ref[...] = jnp.dot(h.astype(jnp.bfloat16), w_ref[...],
                         preferred_element_type=jnp.float32) + bias_ref[...]


def lm_head(x2d, prep, *, seq_len, n_embd):
    rows, Cp = x2d.shape
    Vp = prep["w_head"].shape[1]                 # lane-dense padded vocab
    mb = _rows_per_step(rows, seq_len)
    weights = (prep["g_f"], prep["be_f"], prep["w_head"], prep["b_head"])
    full = lambda a: pl.BlockSpec(a.shape, lambda i: (0,) * a.ndim)

    # TODO(synk): at realistic vocab sizes, tile Vp with a second ('parallel') grid axis
    #             instead of keeping w_head fully VMEM-resident (v7x VMEM budget).
    return pl.pallas_call(
        functools.partial(_lm_head_kernel, n_embd=n_embd),
        out_shape=jax.ShapeDtypeStruct((rows, Vp), jnp.float32),
        grid_spec=pltpu.PrefetchScalarGridSpec(
            num_scalar_prefetch=0,
            grid=(rows // mb,),
            in_specs=[pl.BlockSpec((mb, Cp), lambda i: (i, 0))] + [full(a) for a in weights],
            out_specs=pl.BlockSpec((mb, Vp), lambda i: (i, 0)),
        ),
        compiler_params=pltpu.CompilerParams(
            dimension_semantics=("parallel",),
            vmem_limit_bytes=_VMEM_LIMIT_BYTES),
    )(x2d, *weights)


# ----------------------------------------------------------------------------- full decoder
def transformer_decoder(idx, prep, *, n_heads):
    """idx: (B, T) int32 token ids -> logits (B, T, vocab).  (targets/loss path not implemented)"""
    B, T = idx.shape
    C, V = prep["n_embd"], prep["vocab_size"]
    # TODO(synk): embedding lookups are data-dependent gathers; done with jnp.take outside the kernel
    tok = jnp.take(prep["tok_emb"], idx, axis=0)             # (B, T, Cp), padded lanes zero
    x = tok + prep["pos_emb"][:T][None, :, :]
    x2d = x.reshape(B * T, -1)
    bias = prep["causal_bias"][:T, :T]
    for blk in prep["blocks"]:
        # TODO(synk): at real sizes carry the residual in bf16 between layer calls / prefetch
        #             the next layer's weights cross-call to hide the cold weight DMA.
        x2d = transformer_block(x2d, bias, blk, n_heads=n_heads, seq_len=T, n_embd=C)
    logits_p = lm_head(x2d, prep, seq_len=T, n_embd=C)        # (B*T, Vp) lane-dense
    return logits_p[:, :V].reshape(B, T, V)


# ----------------------------------------------------------------------------- params
def make_params(key, vocab_size, block_size, n_embd, n_heads, num_blocks):
    """f32 master parameters (also used by the pure-JAX reference)."""
    s = 0.05
    keys = jax.random.split(key, 4 + num_blocks)
    params = {
        "tok_emb": s * jax.random.normal(keys[0], (vocab_size, n_embd), jnp.float32),
        "pos_emb": s * jax.random.normal(keys[1], (block_size, n_embd), jnp.float32),
        "g_f": jnp.ones((1, n_embd), jnp.float32),
        "be_f": jnp.zeros((1, n_embd), jnp.float32),
        "w_head": s * jax.random.normal(keys[2], (n_embd, vocab_size), jnp.float32),
        "b_head": s * jax.random.normal(keys[3], (1, vocab_size), jnp.float32),
        "blocks": [],
    }
    for l in range(num_blocks):
        ks = jax.random.split(keys[4 + l], 9)
        params["blocks"].append({
            "wq": s * jax.random.normal(ks[0], (n_embd, n_embd), jnp.float32),
            "wk": s * jax.random.normal(ks[1], (n_embd, n_embd), jnp.float32),
            "wv": s * jax.random.normal(ks[2], (n_embd, n_embd), jnp.float32),
            "wp": s * jax.random.normal(ks[3], (n_embd, n_embd), jnp.float32),
            "bp": s * jax.random.normal(ks[4], (1, n_embd), jnp.float32),
            "w1": s * jax.random.normal(ks[5], (n_embd, 4 * n_embd), jnp.float32),
            "b1": s * jax.random.normal(ks[6], (1, 4 * n_embd), jnp.float32),
            "w2": s * jax.random.normal(ks[7], (4 * n_embd, n_embd), jnp.float32),
            "b2": s * jax.random.normal(ks[8], (1, n_embd), jnp.float32),
            "g1": jnp.ones((1, n_embd), jnp.float32),
            "be1": jnp.zeros((1, n_embd), jnp.float32),
            "g2": jnp.ones((1, n_embd), jnp.float32),
            "be2": jnp.zeros((1, n_embd), jnp.float32),
        })
    return params


def prepare_decoder_params(params, *, n_heads):
    """One-time kernel-side prep: zero-pad every lane dimension to a multiple of 128
    (lane-dense stores) and pre-cast all matmul weights to bf16 (done once, not per call)."""
    C = params["tok_emb"].shape[1]
    V = params["w_head"].shape[1]
    Tmax = params["pos_emb"].shape[0]
    Cp, Fp, Vp = _round128(C), _round128(4 * C), _round128(V)
    hs = C // n_heads

    bf16 = lambda a: a.astype(jnp.bfloat16)
    padc = lambda a, n: _pad_axis(a, 1, n)       # pad columns (lane dim) with zeros
    padr = lambda a, n: _pad_axis(a, 0, n)       # pad rows with zeros

    row = jnp.arange(Tmax)[:, None]
    col = jnp.arange(Tmax)[None, :]
    prep = {
        "n_embd": C,
        "vocab_size": V,
        "tok_emb": padc(params["tok_emb"], Cp),
        "pos_emb": padc(params["pos_emb"], Cp),
        "causal_bias": jnp.where(row >= col, 0.0, -1e30).astype(jnp.float32),
        "g_f": padc(params["g_f"], Cp),          # gamma padded with 0 -> padded lanes stay 0
        "be_f": padc(params["be_f"], Cp),
        "w_head": bf16(padc(padr(params["w_head"], Cp), Vp)),
        "b_head": padc(params["b_head"], Vp),
        "blocks": [],
    }
    for blk in params["blocks"]:
        # fused [q | k | v] weight, head-major columns (matches torch.cat ordering)
        wqkv = jnp.concatenate([blk["wq"], blk["wk"], blk["wv"]], axis=1)     # (C, 3C)
        prep["blocks"].append({
            "wqkv": bf16(padr(wqkv, Cp)),                                     # (Cp, 3C)
            "wp_heads": bf16(padc(blk["wp"], Cp).reshape(n_heads, hs, Cp)),   # (H, hs, Cp)
            "bp": padc(blk["bp"], Cp),
            "w1": bf16(padc(padr(blk["w1"], Cp), Fp)),                        # (Cp, Fp)
            "b1": padc(blk["b1"], Fp),
            "w2": bf16(padc(padr(blk["w2"], Fp), Cp)),                        # (Fp, Cp)
            "b2": padc(blk["b2"], Cp),
            "g1": padc(blk["g1"], Cp), "be1": padc(blk["be1"], Cp),
            "g2": padc(blk["g2"], Cp), "be2": padc(blk["be2"], Cp),
        })
    return prep


# ----------------------------------------------------------------------------- reference
def reference_decoder(idx, params, *, n_heads):
    """Pure-JAX f32 reference mirroring the PyTorch forward (eval mode)."""
    B, T = idx.shape
    C = params["tok_emb"].shape[1]
    hs = C // n_heads
    x = jnp.take(params["tok_emb"], idx, axis=0) + params["pos_emb"][:T][None]

    def ln(v, g, b):
        mu = v.mean(-1, keepdims=True)
        var = ((v - mu) ** 2).mean(-1, keepdims=True)
        return (v - mu) / jnp.sqrt(var + 1e-5) * g + b

    mask = jnp.tril(jnp.ones((T, T), bool))
    for blk in params["blocks"]:
        h1 = ln(x, blk["g1"], blk["be1"])
        outs = []
        for h in range(n_heads):
            q = h1 @ blk["wq"][:, h * hs:(h + 1) * hs]
            k = h1 @ blk["wk"][:, h * hs:(h + 1) * hs]
            v = h1 @ blk["wv"][:, h * hs:(h + 1) * hs]
            wei = jnp.einsum("btd,bsd->bts", q, k) * C ** (-0.5)
            wei = jnp.where(mask, wei, -jnp.inf)
            wei = jax.nn.softmax(wei, axis=-1)
            outs.append(wei @ v)
        attn = jnp.concatenate(outs, axis=-1) @ blk["wp"] + blk["bp"]
        x = x + attn
        h2 = ln(x, blk["g2"], blk["be2"])
        x = x + (jnp.maximum(h2 @ blk["w1"] + blk["b1"], 0.0) @ blk["w2"] + blk["b2"])
    return ln(x, params["g_f"], params["be_f"]) @ params["w_head"] + params["b_head"]


if __name__ == "__main__":
    # small shapes consistent with the module: vocab=65, block_size=8, n_embd=32, 4 heads, 2 blocks
    vocab_size, block_size, n_embd, n_heads, num_blocks = 65, 8, 32, 4, 2
    B, T = 2, block_size
    key = jax.random.PRNGKey(0)
    kidx, kp = jax.random.split(key)
    idx = jax.random.randint(kidx, (B, T), 0, vocab_size, dtype=jnp.int32)
    params = make_params(kp, vocab_size, block_size, n_embd, n_heads, num_blocks)
    prep = prepare_decoder_params(params, n_heads=n_heads)

    logits = transformer_decoder(idx, prep, n_heads=n_heads)
    logits = jax.block_until_ready(logits)

    ref = reference_decoder(idx, params, n_heads=n_heads)
    assert logits.shape == (B, T, vocab_size)
    max_err = float(jnp.max(jnp.abs(logits - ref)))
    # bf16 MXU inputs (f32 accumulation) -> loose tolerance vs the f32 reference
    assert jnp.allclose(logits, ref, atol=5e-2, rtol=5e-2), f"mismatch vs reference (max err {max_err})"
    print("KERNEL_OK")
</pallas_src>

<mosaic_0001>
module attributes {stable_mosaic.version = 11 : i64} {
  func.func @_block_kernel(%arg0: i32, %arg1: memref<16x128xf32, #tpu.memory_space<vmem>>, %arg2: memref<8x8xf32, #tpu.memory_space<vmem>>, %arg3: memref<128x96xbf16, #tpu.memory_space<vmem>>, %arg4: memref<4x8x128xbf16, #tpu.memory_space<vmem>>, %arg5: memref<1x128xf32, #tpu.memory_space<vmem>>, %arg6: memref<128x128xbf16, #tpu.memory_space<vmem>>, %arg7: memref<1x128xf32, #tpu.memory_space<vmem>>, %arg8: memref<128x128xbf16, #tpu.memory_space<vmem>>, %arg9: memref<1x128xf32, #tpu.memory_space<vmem>>, %arg10: memref<1x128xf32, #tpu.memory_space<vmem>>, %arg11: memref<1x128xf32, #tpu.memory_space<vmem>>, %arg12: memref<1x128xf32, #tpu.memory_space<vmem>>, %arg13: memref<1x128xf32, #tpu.memory_space<vmem>>, %arg14: memref<16x128xf32, #tpu.memory_space<vmem>>) attributes {dimension_semantics = [#tpu.dimension_semantics<parallel>], iteration_bounds = array<i64: 1>, scalar_prefetch = 0 : i64, scratch_operands = 0 : i64, tpu.core_type = #tpu.core_type<tc>, window_params = [{transform_indices = @transform_0, window_bounds = array<i64: 16, 128>}, {pipeline_mode = #tpu.pipeline_mode<synchronous>, transform_indices = @transform_1, window_bounds = array<i64: 8, 8>}, {pipeline_mode = #tpu.pipeline_mode<synchronous>, transform_indices = @transform_2, window_bounds = array<i64: 128, 96>}, {pipeline_mode = #tpu.pipeline_mode<synchronous>, transform_indices = @transform_3, window_bounds = array<i64: 4, 8, 128>}, {pipeline_mode = #tpu.pipeline_mode<synchronous>, transform_indices = @transform_4, window_bounds = array<i64: 1, 128>}, {pipeline_mode = #tpu.pipeline_mode<synchronous>, transform_indices = @transform_5, window_bounds = array<i64: 128, 128>}, {pipeline_mode = #tpu.pipeline_mode<synchronous>, transform_indices = @transform_6, window_bounds = array<i64: 1, 128>}, {pipeline_mode = #tpu.pipeline_mode<synchronous>, transform_indices = @transform_7, window_bounds = array<i64: 128, 128>}, {pipeline_mode = #tpu.pipeline_mode<synchronous>, transform_indices = @transform_8, window_bounds = array<i64: 1, 128>}, {pipeline_mode = #tpu.pipeline_mode<synchronous>, transform_indices = @transform_9, window_bounds = array<i64: 1, 128>}, {pipeline_mode = #tpu.pipeline_mode<synchronous>, transform_indices = @transform_10, window_bounds = array<i64: 1, 128>}, {pipeline_mode = #tpu.pipeline_mode<synchronous>, transform_indices = @transform_11, window_bounds = array<i64: 1, 128>}, {pipeline_mode = #tpu.pipeline_mode<synchronous>, transform_indices = @transform_12, window_bounds = array<i64: 1, 128>}, {transform_indices = @transform_13, window_bounds = array<i64: 16, 128>}]} {
    %c0 = arith.constant 0 : index
    %c0_0 = arith.constant 0 : index
    %0 = vector.load %arg1[%c0, %c0_0] : memref<16x128xf32, #tpu.memory_space<vmem>>, vector<16x128xf32>
    %c0_1 = arith.constant 0 : index
    %c0_2 = arith.constant 0 : index
    %1 = vector.load %arg10[%c0_1, %c0_2] : memref<1x128xf32, #tpu.memory_space<vmem>>, vector<1x128xf32>
    %c0_3 = arith.constant 0 : index
    %c0_4 = arith.constant 0 : index
    %2 = vector.load %arg11[%c0_3, %c0_4] : memref<1x128xf32, #tpu.memory_space<vmem>>, vector<1x128xf32>
    %cst = arith.constant dense<0.000000e+00> : vector<16xf32>
    %3 = vector.multi_reduction <add>, %0, %cst [1] : vector<16x128xf32> to vector<16xf32>
    %4 = vector.shape_cast %3 : vector<16xf32> to vector<16x1xf32>
    %cst_5 = arith.constant 3.125000e-02 : f32
    %5 = vector.broadcast %cst_5 : f32 to vector<16x1xf32>
    %6 = arith.mulf %4, %5 : vector<16x1xf32>
    %7 = arith.mulf %0, %0 : vector<16x128xf32>
    %cst_6 = arith.constant dense<0.000000e+00> : vector<16xf32>
    %8 = vector.multi_reduction <add>, %7, %cst_6 [1] : vector<16x128xf32> to vector<16xf32>
    %9 = vector.shape_cast %8 : vector<16xf32> to vector<16x1xf32>
    %cst_7 = arith.constant 3.125000e-02 : f32
    %10 = vector.broadcast %cst_7 : f32 to vector<16x1xf32>
    %11 = arith.mulf %9, %10 : vector<16x1xf32>
    %12 = arith.mulf %6, %6 : vector<16x1xf32>
    %13 = arith.subf %11, %12 : vector<16x1xf32>
    %14 = vector.broadcast %6 : vector<16x1xf32> to vector<16x128xf32>
    %15 = arith.subf %0, %14 : vector<16x128xf32>
    %cst_8 = arith.constant 9.99999974E-6 : f32
    %16 = vector.broadcast %cst_8 : f32 to vector<16x1xf32>
    %17 = arith.addf %13, %16 : vector<16x1xf32>
    %18 = math.rsqrt %17 : vector<16x1xf32>
    %19 = vector.broadcast %18 : vector<16x1xf32> to vector<16x128xf32>
    %20 = arith.mulf %15, %19 : vector<16x128xf32>
    %21 = vector.broadcast %1 : vector<1x128xf32> to vector<16x128xf32>
    %22 = arith.mulf %20, %21 : vector<16x128xf32>
    %23 = vector.broadcast %2 : vector<1x128xf32> to vector<16x128xf32>
    %24 = arith.addf %22, %23 : vector<16x128xf32>
    %25 = arith.truncf %24 : vector<16x128xf32> to vector<16x128xbf16>
    %c0_9 = arith.constant 0 : index
    %c0_10 = arith.constant 0 : index
    %26 = vector.load %arg3[%c0_9, %c0_10] : memref<128x96xbf16, #tpu.memory_space<vmem>>, vector<128x96xbf16>
    %cst_11 = arith.constant dense<0.000000e+00> : vector<16x96xf32>
    %27 = tpu.matmul %25, %26, %cst_11 {dimension_numbers = #tpu.dot_dimension_numbers<[1], [0], [0], [1], [0, 0, 1, 1], [], []>} : vector<16x128xbf16>, vector<128x96xbf16>, vector<16x96xf32> -> vector<16x96xf32>
    %28 = vector.extract_strided_slice %27 {offsets = [0, 0], sizes = [16, 32], strides = [1, 1]} : vector<16x96xf32> to vector<16x32xf32>
    %29 = vector.extract_strided_slice %28 {offsets = [0, 0], sizes = [16, 8], strides = [1, 1]} : vector<16x32xf32> to vector<16x8xf32>
    %30 = vector.shape_cast %29 : vector<16x8xf32> to vector<2x8x8xf32>
    %31 = vector.extract_strided_slice %28 {offsets = [0, 8], sizes = [16, 8], strides = [1, 1]} : vector<16x32xf32> to vector<16x8xf32>
    %32 = vector.shape_cast %31 : vector<16x8xf32> to vector<2x8x8xf32>
    %33 = vector.extract_strided_slice %28 {offsets = [0, 16], sizes = [16, 8], strides = [1, 1]} : vector<16x32xf32> to vector<16x8xf32>
    %34 = vector.shape_cast %33 : vector<16x8xf32> to vector<2x8x8xf32>
    %35 = vector.extract_strided_slice %28 {offsets = [0, 24], sizes = [16, 8], strides = [1, 1]} : vector<16x32xf32> to vector<16x8xf32>
    %36 = vector.shape_cast %35 : vector<16x8xf32> to vector<2x8x8xf32>
    %37 = tpu.concatenate %30, %32, %34, %36 in 0 : vector<2x8x8xf32>, vector<2x8x8xf32>, vector<2x8x8xf32>, vector<2x8x8xf32> -> vector<8x8x8xf32>
    %38 = arith.truncf %37 : vector<8x8x8xf32> to vector<8x8x8xbf16>
    %39 = vector.extract_strided_slice %27 {offsets = [0, 32], sizes = [16, 32], strides = [1, 1]} : vector<16x96xf32> to vector<16x32xf32>
    %40 = vector.extract_strided_slice %39 {offsets = [0, 0], sizes = [16, 8], strides = [1, 1]} : vector<16x32xf32> to vector<16x8xf32>
    %41 = vector.shape_cast %40 : vector<16x8xf32> to vector<2x8x8xf32>
    %42 = vector.extract_strided_slice %39 {offsets = [0, 8], sizes = [16, 8], strides = [1, 1]} : vector<16x32xf32> to vector<16x8xf32>
    %43 = vector.shape_cast %42 : vector<16x8xf32> to vector<2x8x8xf32>
    %44 = vector.extract_strided_slice %39 {offsets = [0, 16], sizes = [16, 8], strides = [1, 1]} : vector<16x32xf32> to vector<16x8xf32>
    %45 = vector.shape_cast %44 : vector<16x8xf32> to vector<2x8x8xf32>
    %46 = vector.extract_strided_slice %39 {offsets = [0, 24], sizes = [16, 8], strides = [1, 1]} : vector<16x32xf32> to vector<16x8xf32>
    %47 = vector.shape_cast %46 : vector<16x8xf32> to vector<2x8x8xf32>
    %48 = tpu.concatenate %41, %43, %45, %47 in 0 : vector<2x8x8xf32>, vector<2x8x8xf32>, vector<2x8x8xf32>, vector<2x8x8xf32> -> vector<8x8x8xf32>
    %49 = arith.truncf %48 : vector<8x8x8xf32> to vector<8x8x8xbf16>
    %50 = vector.extract_strided_slice %27 {offsets = [0, 64], sizes = [16, 32], strides = [1, 1]} : vector<16x96xf32> to vector<16x32xf32>
    %51 = vector.extract_strided_slice %50 {offsets = [0, 0], sizes = [16, 8], strides = [1, 1]} : vector<16x32xf32> to vector<16x8xf32>
    %52 = vector.shape_cast %51 : vector<16x8xf32> to vector<2x8x8xf32>
    %53 = vector.extract_strided_slice %50 {offsets = [0, 8], sizes = [16, 8], strides = [1, 1]} : vector<16x32xf32> to vector<16x8xf32>
    %54 = vector.shape_cast %53 : vector<16x8xf32> to vector<2x8x8xf32>
    %55 = vector.extract_strided_slice %50 {offsets = [0, 16], sizes = [16, 8], strides = [1, 1]} : vector<16x32xf32> to vector<16x8xf32>
    %56 = vector.shape_cast %55 : vector<16x8xf32> to vector<2x8x8xf32>
    %57 = vector.extract_strided_slice %50 {offsets = [0, 24], sizes = [16, 8], strides = [1, 1]} : vector<16x32xf32> to vector<16x8xf32>
    %58 = vector.shape_cast %57 : vector<16x8xf32> to vector<2x8x8xf32>
    %59 = tpu.concatenate %52, %54, %56, %58 in 0 : vector<2x8x8xf32>, vector<2x8x8xf32>, vector<2x8x8xf32>, vector<2x8x8xf32> -> vector<8x8x8xf32>
    %60 = arith.truncf %59 : vector<8x8x8xf32> to vector<8x8x8xbf16>
    "tpu.trace_start"() <{level = 10 : i32, message = "btd,bsd->bts"}> : () -> ()
    %cst_12 = arith.constant dense<0.000000e+00> : vector<8x8x8xf32>
    %61 = tpu.matmul %38, %49, %cst_12 {dimension_numbers = #tpu.dot_dimension_numbers<[2], [2], [1], [1], [0, 0, 0, 1, 1, 1], [0], [0]>} : vector<8x8x8xbf16>, vector<8x8x8xbf16>, vector<8x8x8xf32> -> vector<8x8x8xf32>
    "tpu.trace_stop"() : () -> ()
    %cst_13 = arith.constant 0.176776692 : f32
    %62 = vector.broadcast %cst_13 : f32 to vector<8x8x8xf32>
    %63 = arith.mulf %61, %62 : vector<8x8x8xf32>
    %c0_14 = arith.constant 0 : index
    %c0_15 = arith.constant 0 : index
    %64 = vector.load %arg2[%c0_14, %c0_15] : memref<8x8xf32, #tpu.memory_space<vmem>>, vector<8x8xf32>
    %65 = vector.shape_cast %64 : vector<8x8xf32> to vector<1x8x8xf32>
    %66 = vector.broadcast %65 : vector<1x8x8xf32> to vector<8x8x8xf32>
    %67 = arith.addf %63, %66 : vector<8x8x8xf32>
    %cst_16 = arith.constant dense<0xFF800000> : vector<8x8xf32>
    %68 = vector.multi_reduction <maximumf>, %67, %cst_16 [2] : vector<8x8x8xf32> to vector<8x8xf32>
    %69 = vector.shape_cast %68 : vector<8x8xf32> to vector<8x8x1xf32>
    %70 = vector.broadcast %69 : vector<8x8x1xf32> to vector<8x8x8xf32>
    %71 = arith.subf %67, %70 : vector<8x8x8xf32>
    %72 = math.exp %71 : vector<8x8x8xf32>
    %cst_17 = arith.constant dense<0.000000e+00> : vector<8x8xf32>
    %73 = vector.multi_reduction <add>, %72, %cst_17 [2] : vector<8x8x8xf32> to vector<8x8xf32>
    %74 = vector.shape_cast %73 : vector<8x8xf32> to vector<8x8x1xf32>
    %75 = tpu.reciprocal %74 {approx = true} : vector<8x8x1xf32> -> vector<8x8x1xf32>
    %76 = vector.broadcast %75 : vector<8x8x1xf32> to vector<8x8x8xf32>
    %77 = arith.mulf %72, %76 : vector<8x8x8xf32>
    %78 = arith.truncf %77 : vector<8x8x8xf32> to vector<8x8x8xbf16>
    "tpu.trace_start"() <{level = 10 : i32, message = "bts,bsd->btd"}> : () -> ()
    %cst_18 = arith.constant dense<0.000000e+00> : vector<8x8x8xf32>
    %79 = tpu.matmul %78, %60, %cst_18 {dimension_numbers = #tpu.dot_dimension_numbers<[2], [1], [1], [2], [0, 0, 0, 1, 1, 2], [0], [0]>} : vector<8x8x8xbf16>, vector<8x8x8xbf16>, vector<8x8x8xf32> -> vector<8x8x8xf32>
    "tpu.trace_stop"() : () -> ()
    %80 = vector.shape_cast %79 : vector<8x8x8xf32> to vector<4x16x8xf32>
    %81 = arith.truncf %80 : vector<4x16x8xf32> to vector<4x16x8xbf16>
    %c0_19 = arith.constant 0 : index
    %c0_20 = arith.constant 0 : index
    %c0_21 = arith.constant 0 : index
    %82 = vector.load %arg4[%c0_19, %c0_20, %c0_21] : memref<4x8x128xbf16, #tpu.memory_space<vmem>>, vector<4x8x128xbf16>
    "tpu.trace_start"() <{level = 10 : i32, message = "hmd,hdc->hmc"}> : () -> ()
    %cst_22 = arith.constant dense<0.000000e+00> : vector<4x16x128xf32>
    %83 = tpu.matmul %81, %82, %cst_22 {dimension_numbers = #tpu.dot_dimension_numbers<[2], [1], [1], [2], [0, 0, 0, 1, 1, 2], [0], [0]>} : vector<4x16x8xbf16>, vector<4x8x128xbf16>, vector<4x16x128xf32> -> vector<4x16x128xf32>
    "tpu.trace_stop"() : () -> ()
    %cst_23 = arith.constant dense<0.000000e+00> : vector<16x128xf32>
    %84 = vector.multi_reduction <add>, %83, %cst_23 [0] : vector<4x16x128xf32> to vector<16x128xf32>
    %c0_24 = arith.constant 0 : index
    %c0_25 = arith.constant 0 : index
    %85 = vector.load %arg5[%c0_24, %c0_25] : memref<1x128xf32, #tpu.memory_space<vmem>>, vector<1x128xf32>
    %86 = vector.broadcast %85 : vector<1x128xf32> to vector<16x128xf32>
    %87 = arith.addf %84, %86 : vector<16x128xf32>
    %88 = arith.addf %0, %87 : vector<16x128xf32>
    %c0_26 = arith.constant 0 : index
    %c0_27 = arith.constant 0 : index
    %89 = vector.load %arg12[%c0_26, %c0_27] : memref<1x128xf32, #tpu.memory_space<vmem>>, vector<1x128xf32>
    %c0_28 = arith.constant 0 : index
    %c0_29 = arith.constant 0 : index
    %90 = vector.load %arg13[%c0_28, %c0_29] : memref<1x128xf32, #tpu.memory_space<vmem>>, vector<1x128xf32>
    %cst_30 = arith.constant dense<0.000000e+00> : vector<16xf32>
    %91 = vector.multi_reduction <add>, %88, %cst_30 [1] : vector<16x128xf32> to vector<16xf32>
    %92 = vector.shape_cast %91 : vector<16xf32> to vector<16x1xf32>
    %cst_31 = arith.constant 3.125000e-02 : f32
    %93 = vector.broadcast %cst_31 : f32 to vector<16x1xf32>
    %94 = arith.mulf %92, %93 : vector<16x1xf32>
    %95 = arith.mulf %88, %88 : vector<16x128xf32>
    %cst_32 = arith.constant dense<0.000000e+00> : vector<16xf32>
    %96 = vector.multi_reduction <add>, %95, %cst_32 [1] : vector<16x128xf32> to vector<16xf32>
    %97 = vector.shape_cast %96 : vector<16xf32> to vector<16x1xf32>
    %cst_33 = arith.constant 3.125000e-02 : f32
    %98 = vector.broadcast %cst_33 : f32 to vector<16x1xf32>
    %99 = arith.mulf %97, %98 : vector<16x1xf32>
    %100 = arith.mulf %94, %94 : vector<16x1xf32>
    %101 = arith.subf %99, %100 : vector<16x1xf32>
    %102 = vector.broadcast %94 : vector<16x1xf32> to vector<16x128xf32>
    %103 = arith.subf %88, %102 : vector<16x128xf32>
    %cst_34 = arith.constant 9.99999974E-6 : f32
    %104 = vector.broadcast %cst_34 : f32 to vector<16x1xf32>
    %105 = arith.addf %101, %104 : vector<16x1xf32>
    %106 = math.rsqrt %105 : vector<16x1xf32>
    %107 = vector.broadcast %106 : vector<16x1xf32> to vector<16x128xf32>
    %108 = arith.mulf %103, %107 : vector<16x128xf32>
    %109 = vector.broadcast %89 : vector<1x128xf32> to vector<16x128xf32>
    %110 = arith.mulf %108, %109 : vector<16x128xf32>
    %111 = vector.broadcast %90 : vector<1x128xf32> to vector<16x128xf32>
    %112 = arith.addf %110, %111 : vector<16x128xf32>
    %113 = arith.truncf %112 : vector<16x128xf32> to vector<16x128xbf16>
    %c0_35 = arith.constant 0 : index
    %c0_36 = arith.constant 0 : index
    %114 = vector.load %arg6[%c0_35, %c0_36] : memref<128x128xbf16, #tpu.memory_space<vmem>>, vector<128x128xbf16>
    %cst_37 = arith.constant dense<0.000000e+00> : vector<16x128xf32>
    %115 = tpu.matmul %113, %114, %cst_37 {dimension_numbers = #tpu.dot_dimension_numbers<[1], [0], [0], [1], [0, 0, 1, 1], [], []>} : vector<16x128xbf16>, vector<128x128xbf16>, vector<16x128xf32> -> vector<16x128xf32>
    %c0_38 = arith.constant 0 : index
    %c0_39 = arith.constant 0 : index
    %116 = vector.load %arg7[%c0_38, %c0_39] : memref<1x128xf32, #tpu.memory_space<vmem>>, vector<1x128xf32>
    %117 = vector.broadcast %116 : vector<1x128xf32> to vector<16x128xf32>
    %118 = arith.addf %115, %117 : vector<16x128xf32>
    %cst_40 = arith.constant 0.000000e+00 : f32
    %119 = vector.broadcast %cst_40 : f32 to vector<16x128xf32>
    %120 = arith.maximumf %118, %119 : vector<16x128xf32>
    %121 = arith.truncf %120 : vector<16x128xf32> to vector<16x128xbf16>
    %c0_41 = arith.constant 0 : index
    %c0_42 = arith.constant 0 : index
    %122 = vector.load %arg8[%c0_41, %c0_42] : memref<128x128xbf16, #tpu.memory_space<vmem>>, vector<128x128xbf16>
    %cst_43 = arith.constant dense<0.000000e+00> : vector<16x128xf32>
    %123 = tpu.matmul %121, %122, %cst_43 {dimension_numbers = #tpu.dot_dimension_numbers<[1], [0], [0], [1], [0, 0, 1, 1], [], []>} : vector<16x128xbf16>, vector<128x128xbf16>, vector<16x128xf32> -> vector<16x128xf32>
    %c0_44 = arith.constant 0 : index
    %c0_45 = arith.constant 0 : index
    %124 = vector.load %arg9[%c0_44, %c0_45] : memref<1x128xf32, #tpu.memory_space<vmem>>, vector<1x128xf32>
    %125 = vector.broadcast %124 : vector<1x128xf32> to vector<16x128xf32>
    %126 = arith.addf %123, %125 : vector<16x128xf32>
    %127 = arith.addf %88, %126 : vector<16x128xf32>
    %c0_46 = arith.constant 0 : index
    %c0_47 = arith.constant 0 : index
    %128 = vector.load %arg14[%c0_46, %c0_47] : memref<16x128xf32, #tpu.memory_space<vmem>>, vector<16x128xf32>
    tpu.vector_store %arg14[%c0_46, %c0_47], %127 {strides = array<i32>} : memref<16x128xf32, #tpu.memory_space<vmem>>, vector<16x128xf32>,
    return
  }
  func.func @transform_0(%arg0: i32) -> (i32, i32) {
    %c0_i32 = arith.constant 0 : i32
    %c0_i32_0 = arith.constant 0 : i32
    return %arg0, %c0_i32 : i32, i32
  }
  func.func @transform_1(%arg0: i32) -> (i32, i32) {
    %c0_i32 = arith.constant 0 : i32
    %c0_i32_0 = arith.constant 0 : i32
    %c0_i32_1 = arith.constant 0 : i32
    return %c0_i32, %c0_i32_0 : i32, i32
  }
  func.func @transform_2(%arg0: i32) -> (i32, i32) {
    %c0_i32 = arith.constant 0 : i32
    %c0_i32_0 = arith.constant 0 : i32
    %c0_i32_1 = arith.constant 0 : i32
    return %c0_i32, %c0_i32_0 : i32, i32
  }
  func.func @transform_3(%arg0: i32) -> (i32, i32, i32) {
    %c0_i32 = arith.constant 0 : i32
    %c0_i32_0 = arith.constant 0 : i32
    %c0_i32_1 = arith.constant 0 : i32
    %c0_i32_2 = arith.constant 0 : i32
    return %c0_i32, %c0_i32_0, %c0_i32_1 : i32, i32, i32
  }
  func.func @transform_4(%arg0: i32) -> (i32, i32) {
    %c0_i32 = arith.constant 0 : i32
    %c0_i32_0 = arith.constant 0 : i32
    %c0_i32_1 = arith.constant 0 : i32
    return %c0_i32, %c0_i32_0 : i32, i32
  }
  func.func @transform_5(%arg0: i32) -> (i32, i32) {
    %c0_i32 = arith.constant 0 : i32
    %c0_i32_0 = arith.constant 0 : i32
    %c0_i32_1 = arith.constant 0 : i32
    return %c0_i32, %c0_i32_0 : i32, i32
  }
  func.func @transform_6(%arg0: i32) -> (i32, i32) {
    %c0_i32 = arith.constant 0 : i32
    %c0_i32_0 = arith.constant 0 : i32
    %c0_i32_1 = arith.constant 0 : i32
    return %c0_i32, %c0_i32_0 : i32, i32
  }
  func.func @transform_7(%arg0: i32) -> (i32, i32) {
    %c0_i32 = arith.constant 0 : i32
    %c0_i32_0 = arith.constant 0 : i32
    %c0_i32_1 = arith.constant 0 : i32
    return %c0_i32, %c0_i32_0 : i32, i32
  }
  func.func @transform_8(%arg0: i32) -> (i32, i32) {
    %c0_i32 = arith.constant 0 : i32
    %c0_i32_0 = arith.constant 0 : i32
    %c0_i32_1 = arith.constant 0 : i32
    return %c0_i32, %c0_i32_0 : i32, i32
  }
  func.func @transform_9(%arg0: i32) -> (i32, i32) {
    %c0_i32 = arith.constant 0 : i32
    %c0_i32_0 = arith.constant 0 : i32
    %c0_i32_1 = arith.constant 0 : i32
    return %c0_i32, %c0_i32_0 : i32, i32
  }
  func.func @transform_10(%arg0: i32) -> (i32, i32) {
    %c0_i32 = arith.constant 0 : i32
    %c0_i32_0 = arith.constant 0 : i32
    %c0_i32_1 = arith.constant 0 : i32
    return %c0_i32, %c0_i32_0 : i32, i32
  }
  func.func @transform_11(%arg0: i32) -> (i32, i32) {
    %c0_i32 = arith.constant 0 : i32
    %c0_i32_0 = arith.constant 0 : i32
    %c0_i32_1 = arith.constant 0 : i32
    return %c0_i32, %c0_i32_0 : i32, i32
  }
  func.func @transform_12(%arg0: i32) -> (i32, i32) {
    %c0_i32 = arith.constant 0 : i32
    %c0_i32_0 = arith.constant 0 : i32
    %c0_i32_1 = arith.constant 0 : i32
    return %c0_i32, %c0_i32_0 : i32, i32
  }
  func.func @transform_13(%arg0: i32) -> (i32, i32) {
    %c0_i32 = arith.constant 0 : i32
    %c0_i32_0 = arith.constant 0 : i32
    return %arg0, %c0_i32 : i32, i32
  }
}

</mosaic_0001>

<bundles_post_ra>
// kernel: tpu_custom_call.1
= control target key start
LH: loop header
LB: loop body
LE: loop exit
PB: predicated region body
PF: predicated region fallthrough
CT: control target
= control target key end

     0   :  { %18 = vsyncpa [#allocation3], 0  ;;  %s2523_s0 = inlined_call_operand.vmem [shape: f32[16,128], index: 0, kind: input, shape index: {}]   ;;  %s2524_s1 = inlined_call_operand.vmem [shape: f32[8,8], index: 1, kind: input, shape index: {}]   ;;  %s2525_s2 = inlined_call_operand.vmem [shape: bf16[128,96], index: 2, kind: input, shape index: {}]   ;;  %s2526_s3 = inlined_call_operand.vmem [shape: bf16[4,8,128], index: 3, kind: input, shape index: {}]   ;;  %s2527_s4 = inlined_call_operand.vmem [shape: f32[1,128], index: 4, kind: input, shape index: {}]   ;;  %s2528_s5 = inlined_call_operand.vmem [shape: bf16[128,128], index: 5, kind: input, shape index: {}]   ;;  %s2529_s6 = inlined_call_operand.vmem [shape: f32[1,128], index: 6, kind: input, shape index: {}]   ;;  %s2530_s7 = inlined_call_operand.hbm [shape: bf16[128,128], index: 7, kind: input, shape index: {}]   ;;  %s2531_s8 = inlined_call_operand.vmem [shape: f32[1,128], index: 8, kind: input, shape index: {}]   ;;  %s2532_s9 = inlined_call_operand.vmem [shape: f32[1,128], index: 9, kind: input, shape index: {}]   ;;  %s2533_s10 = inlined_call_operand.vmem [shape: f32[1,128], index: 10, kind: input, shape index: {}]   ;;  %s2534_s11 = inlined_call_operand.vmem [shape: f32[1,128], index: 11, kind: input, shape index: {}]   ;;  %s2535_s12 = inlined_call_operand.vmem [shape: f32[1,128], index: 12, kind: input, shape index: {}]   ;;  %s2536_s13 = inlined_call_operand.hbm [shape: f32[16,128], index: 13, kind: output, shape index: {}]  }
   0x1   :  { %19 = vsyncpa [#allocation4], 0  ;;  %s2065_s25 = smov [#allocation2]  }
   0x2   :  { %s39_s26 = sshll.u32 %s2065_s25, 4  ;;  %s40_s26 = int_to_ptr.vmem [resolvable:$true] %s39_s26 }
   0x3   :  { %s2029_s27 = scalar_lea.vmem %s40_s26, 1024  ;;  %p2034_p1 = scmp.lt.s32.totalorder %s40_s26, %s40_s26 }
   0x4   :  { %p2030_p0 = scmp.ne.s32.totalorder %s40_s26, %s2029_s27  ;;  %p2035_p2 = scmp.lt.s32.totalorder %s2029_s27, %s2029_s27 }
   0x6   :  { %p2036_p3 = por %p2035_p2, %p2034_p1 }
   0x8   :  { %p2037_p4 = pnand %p2036_p3, %p2030_p0 }
   0xa   :  { %2040 = shalt.err (!%p2037_p4)
}
   0xb   :  { %s2066_s28 = smov 64   ;;  %s2067_s29 = smov 4  }
   0xc   :  { %45 = dma.hbm_to_vmem [thread:$0]  %s2530_s7, 1024, %s40_s26, [#allocation3], %s2066_s28, %s2066_s28, %s2067_s29  }
   0xd   :  { %2061 = dma.done.wait [#allocation3], 1024  }
   0xe   :  { %2062 = vsyncadd [#allocation3], 4294966272  ;;  %v2155_v0 = vld [vmem:[%s2523_s0] sm:$0xff]  ;;  %v2160_v1 = vld [vmem:[%s2523_s0 + $0x8] sm:$0xff]  ;;  %v2068_v5 = vmov 0.0   ;;  %vm2069_vm0 = vmmov 0  }
   0xf   :  { %64 = vadd.xlane.f32.xlu0 %v2155_v0  ;;  %v70_v2 = vmul.f32 %v2155_v0, %v2155_v0  ;;  %v71_v3 = vmul.f32 %v2160_v1, %v2160_v1  ;;  %v1957_v4 = vld [vmem:[%s2525_s2 + $0x38] sm:$0xff]   ;;  %1755 = vmatprep.subr.bf16.mxu0 %v2068_v5  ;;  %v1958_v6 = vld [vmem:[%s2525_s2 + $0x30] sm:$0xff]   ;;  %v1959_v7 = vld [vmem:[%s2525_s2 + $0x28] sm:$0xff]   ;;  %s2070_s19 = smov 120   ;;  %s2073_s0 = smov 104   ;;  %vm243_vm1 = vcmask 64512  }
  0x10   :  { %1775 = vmatprep.subr.bf16.mxu1 %v2068_v5  ;;  %1756 = vmatpush3.bf16.msra.mxu0 %v1957_v4  ;;  %v1960_v8 = vld [vmem:[%s2525_s2 + $0x20] sm:$0xff]   ;;  %v1961_v9 = vld [vmem:[%s2525_s2 + $0x18] sm:$0xff]   ;;  %v1962_v10 = vld [vmem:[%s2525_s2 + $0x10] sm:$0xff]   ;;  %vm751_vm2 = vcmask 1043456  }
  0x11   :  { %72 = vadd.xlane.f32.xlu1 %v70_v2  ;;  %1757 = vmatprep.subr.bf16.mxu0 %v2068_v5  ;;  %v1963_v11 = vld [vmem:[%s2525_s2 + $0x8] sm:$0xff]   ;;  %v1964_v12 = vld [vmem:[%s2525_s2] sm:$0xff]  }
  0x12   :  { %1771 = vmatprep.mubr.msk.bf16.mxu0 %vm2069_vm0, %v2068_v5  ;;  %1777 = vmatprep.mubr.msk.bf16.mxu1 %vm2069_vm0, %v2068_v5  ;;  %v1637_v30 = vld [vmem:[%s2532_s9] ss:$0 sm:$0xff]  ;;  %s2071_s9 = smov 96  }
  0x13   :  { %66 = vadd.xlane.f32.xlu0 %v2160_v1  ;;  %v1638_v35 = vld [vmem:[%s2533_s10] ss:$0 sm:$0xff]  ;;  %s2072_s10 = smov 112  }
  0x14   :  { %1758 = vmatpush3.bf16.msra.mxu0 %v1958_v6 }
  0x15   :  { %74 = vadd.xlane.f32.xlu1 %v71_v3  ;;  %1759 = vmatprep.subr.bf16.mxu0 %v2068_v5 }
  0x18   :  { %1760 = vmatpush3.bf16.msra.mxu0 %v1959_v7 }
  0x19   :  { %1761 = vmatprep.subr.bf16.mxu0 %v2068_v5 }
  0x1c   :  { %1762 = vmatpush3.bf16.msra.mxu0 %v1960_v8 }
  0x1d   :  { %1763 = vmatprep.subr.bf16.mxu0 %v2068_v5 }
  0x20   :  { %1764 = vmatpush3.bf16.msra.mxu0 %v1961_v9 }
  0x21   :  { %1765 = vmatprep.subr.bf16.mxu0 %v2068_v5 }
  0x24   :  { %1766 = vmatpush3.bf16.msra.mxu0 %v1962_v10 }
  0x25   :  { %1767 = vmatprep.subr.bf16.mxu0 %v2068_v5 }
  0x28   :  { %1768 = vmatpush3.bf16.msra.mxu0 %v1963_v11 }
  0x29   :  { %1769 = vmatprep.subr.bf16.mxu0 %v2068_v5 }
  0x2c   :  { %1770 = vmatpush3.bf16.msra.mxu0 %v1964_v12 }
  0x2d   :  { %1799 = vmatprep.subr.bf16.mxu0 %v2068_v5 }
  0x98   :  { %v65_v13 = vpop.xlane.xlu0 %64 }
  0x99   :  { %v68_v14 = vmul.f32 0.03125, %v65_v13 }
  0x9a   :  { %v73_v15 = vpop.xlane.xlu1 %72 }
  0x9b   :  { %v78_v16 = vmul.f32 %v68_v14, %v68_v14  ;;  %v76_v17 = vmul.f32 0.03125, %v73_v15  ;;  %v82_v27 = vsub.f32 %v2155_v0, %v68_v14 }
  0x9c   :  { %v67_v18 = vpop.xlane.xlu0 %66 }
  0x9d   :  { %v80_v19 = vsub.f32 %v76_v17, %v78_v16  ;;  %v69_v20 = vmul.f32 0.03125, %v67_v18  ;;  %v641_v17 = vld [vmem:[%s2524_s1] sm:$0xff] }
  0x9e   :  { %v75_v21 = vpop.xlane.xlu1 %74 }
  0x9f   :  { %v84_v22 = vadd.f32 1e-05, %v80_v19  ;;  %v79_v23 = vmul.f32 %v69_v20, %v69_v20  ;;  %v77_v24 = vmul.f32 0.03125, %v75_v21  ;;  %v83_v31 = vsub.f32 %v2160_v1, %v69_v20 }
  0xa1   :  { %1981 = vrsqrt.f32 %v84_v22  ;;  %v81_v25 = vsub.f32 %v77_v24, %v79_v23 }
  0xa3   :  { %v85_v26 = vadd.f32 1e-05, %v81_v25 }
  0xa5   :  { %1983 = vrsqrt.f32 %v85_v26 }
  0xae   :  { %v1982_v28 = vpop.eup %1981 }
  0xaf   :  { %v88_v29 = vmul.f32 %v1982_v28, %v82_v27 }
  0xb1   :  { %v96_v34 = vmul.f32 %v1637_v30, %v88_v29 }
  0xb2   :  { %v1984_v32 = vpop.eup %1983 }
  0xb3   :  { %v89_v33 = vmul.f32 %v1984_v32, %v83_v31  ;;  %v104_v37 = vadd.f32 %v1638_v35, %v96_v34 }
  0xb5   :  { %v97_v36 = vmul.f32 %v1637_v30, %v89_v33 }
  0xb7   :  { %v105_v38 = vadd.f32 %v1638_v35, %v97_v36 }
  0xb9   :  { %v106_v39 = vpack.c.bf16 %v105_v38, %v104_v37 }
  0xbb   :  { %1772 = vmatmul.mubr.bf16.vlgmr.msra.gmra.mxu0 %v106_v39 }
  0xbc   :  { %1801 = vmatprep.mubr.msk.bf16.mxu0 %vm2069_vm0, %v2068_v5 }
 0x17b   :  { %v205_v40 = vpop.f32.mrf.mxu0 }
 0x17c   :  { %214 = vrot.lane.b32.xlu0 %v205_v40, %s2070_s19  ;;  %v2216_v42 = vpack.c.bf16 %v205_v40, %v205_v40 }
 0x17d   :  { %v1773_v41 = vpop.f32.mrf.mxu0 }
 0x17f   :  { %v208_v43 = vpop.f32.mrf.mxu0 }
 0x180   :  { %241 = vrot.lane.b32.xlu0 %v2216_v42, %s2071_s9  ;;  %216 = vrot.lane.b32.xlu1 %v208_v43, %s2070_s19  ;;  %v1947_v45 = vpack.i.bf16 %v208_v43, %v205_v40  ;;  %v2220_v46 = vpack.c.bf16 %v208_v43, %v208_v43 }
 0x181   :  { %v1774_v44 = vpop.f32.mrf.mxu0 }
 0x184   :  { %1948 = vrot.lane.b32.xlu1 %v1947_v45, %s2072_s10 }
 0x188   :  { %1953 = vrot.lane.b32.xlu1 %v1947_v45, %s2073_s0 }
 0x18c   :  { %291 = vrot.lane.b32.xlu1 %v2220_v46, %s2071_s9 }
 0x1ee   :  { %v215_v47 = vpop.permute.xlu0 %214 }
 0x1ef   :  { %v2224_v48 = vpack.c.bf16 %v215_v47, %v215_v47 }
 0x1f1   :  { %340 = vrot.lane.b32.xlu0 %v2224_v48, %s2071_s9 }
 0x1f2   :  { %v242_v49 = vpop.permute.xlu0 %241  ;;  %v217_v50 = vpop.permute.xlu1 %216 }
 0x1f3   :  { %v2228_v51 = vpack.c.bf16 %v217_v50, %v217_v50  ;;  %v248_v52 = vsel %vm243_vm1, %v242_v49, 0 }
 0x1f4   :  { %1776 = vmatpush3.bf16.xpose.msra.mxu1 %v248_v52 }
 0x1f5   :  { %389 = vrot.lane.b32.xlu1 %v2228_v51, %s2071_s9  ;;  %1781 = vmatprep.subr.bf16.mxu1 %v2068_v5 }
 0x1f6   :  { %v1949_v53 = vpop.permute.xlu1 %1948 }
 0x1f7   :  { %v1951_v54 = vunpack.i.h.bf16 %v1949_v53  ;;  %v1950_v55 = vunpack.i.l.bf16 %v1949_v53 }
 0x1f9   :  { %v2234_v56 = vpack.c.bf16 %v1951_v54, %v1951_v54  ;;  %v2236_v57 = vpack.c.bf16 %v1950_v55, %v1950_v55 }
 0x1fa   :  { %v1954_v58 = vpop.permute.xlu1 %1953 }
 0x1fb   :  { %v1956_v59 = vunpack.i.h.bf16 %v1954_v58  ;;  %v1955_v60 = vunpack.i.l.bf16 %v1954_v58  ;;  %1778 = vmatmul.mubr.msk.bf16.vlgmr.msra.gmra.mxu1 %vm243_vm1, %v2216_v42  ;;  %438 = vrot.lane.b32.xlu0 %v2236_v57, %s2071_s9 }
 0x1fc   :  { %487 = vrot.lane.b32.xlu1 %v2234_v56, %s2071_s9  ;;  %1783 = vmatprep.mubr.msk.bf16.mxu1 %vm2069_vm0, %v2068_v5 }
 0x1fd   :  { %v2246_v61 = vpack.c.bf16 %v1956_v59, %v1956_v59  ;;  %v2248_v62 = vpack.c.bf16 %v1955_v60, %v1955_v60 }
 0x1fe   :  { %v292_v63 = vpop.permute.xlu1 %291 }
 0x1ff   :  { %v297_v2 = vsel %vm243_vm1, %v292_v63, 0  ;;  %536 = vrot.lane.b32.xlu0 %v2248_v62, %s2071_s9 }
 0x200   :  { %585 = vrot.lane.b32.xlu1 %v2246_v61, %s2071_s9  ;;  %1782 = vmatpush3.bf16.xpose.msra.mxu1 %v297_v2 }
 0x201   :  { %1787 = vmatprep.subr.bf16.mxu1 %v2068_v5 }
 0x207   :  { %1784 = vmatmul.mubr.msk.bf16.vlgmr.msra.gmra.mxu1 %vm243_vm1, %v2220_v46 }
 0x208   :  { %1789 = vmatprep.mubr.msk.bf16.mxu1 %vm2069_vm0, %v2068_v5 }
 0x263   :  { %v341_v3 = vpop.permute.xlu0 %340 }
 0x264   :  { %v346_v4 = vsel %vm243_vm1, %v341_v3, 0 }
 0x265   :  { %1788 = vmatpush3.bf16.xpose.msra.mxu1 %v346_v4 }
 0x266   :  { %1793 = vmatprep.subr.bf16.mxu1 %v2068_v5 }
 0x267   :  { %v390_v6 = vpop.permute.xlu1 %389 }
 0x268   :  { %v395_v7 = vsel %vm243_vm1, %v390_v6, 0 }
 0x26c   :  { %1790 = vmatmul.mubr.msk.bf16.vlgmr.msra.gmra.mxu1 %vm243_vm1, %v2224_v48 }
 0x26d   :  { %v439_v8 = vpop.permute.xlu0 %438  ;;  %1794 = vmatpush3.bf16.xpose.msra.mxu1 %v395_v7  ;;  %1795 = vmatprep.mubr.msk.bf16.mxu1 %vm2069_vm0, %v2068_v5 }
 0x26e   :  { %v444_v9 = vsel %vm243_vm1, %v439_v8, 0  ;;  %1805 = vmatprep.subr.bf16.mxu1 %v2068_v5  ;;  %v488_v10 = vpop.permute.xlu1 %487 }
 0x26f   :  { %1800 = vmatpush3.bf16.xpose.msra.mxu0 %v444_v9  ;;  %v493_v12 = vsel %vm243_vm1, %v488_v10, 0 }
 0x270   :  { %1811 = vmatprep.subr.bf16.mxu0 %v2068_v5 }
 0x271   :  { %v537_v11 = vpop.permute.xlu0 %536 }
 0x272   :  { %v542_v13 = vsel %vm243_vm1, %v537_v11, 0  ;;  %v586_v14 = vpop.permute.xlu1 %585 }
 0x273   :  { %v591_v15 = vsel %vm243_vm1, %v586_v14, 0 }
 0x274   :  { %1796 = vmatmul.mubr.msk.bf16.vlgmr.msra.gmra.mxu1 %vm243_vm1, %v2228_v51 }
 0x275   :  { %1806 = vmatpush3.bf16.xpose.msra.mxu1 %v493_v12  ;;  %1807 = vmatprep.mubr.msk.bf16.mxu1 %vm2069_vm0, %v2068_v5 }
 0x276   :  { %1802 = vmatmul.mubr.msk.bf16.vlgmr.msra.gmra.mxu0 %vm243_vm1, %v2236_v57  ;;  %1817 = vmatprep.subr.bf16.mxu1 %v2068_v5 }
 0x277   :  { %1812 = vmatpush3.bf16.xpose.msra.mxu0 %v542_v13  ;;  %1813 = vmatprep.mubr.msk.bf16.mxu0 %vm2069_vm0, %v2068_v5 }
 0x278   :  { %1823 = vmatprep.subr.bf16.mxu0 %v2068_v5 }
 0x27c   :  { %1808 = vmatmul.mubr.msk.bf16.vlgmr.msra.gmra.mxu1 %vm243_vm1, %v2234_v56 }
 0x27d   :  { %1818 = vmatpush3.bf16.xpose.msra.mxu1 %v591_v15  ;;  %1819 = vmatprep.mubr.msk.bf16.mxu1 %vm2069_vm0, %v2068_v5 }
 0x27e   :  { %1814 = vmatmul.mubr.msk.bf16.vlgmr.msra.gmra.mxu0 %vm243_vm1, %v2248_v62  ;;  %1829 = vmatprep.subr.bf16.mxu1 %v2068_v5 }
 0x27f   :  { %1825 = vmatprep.mubr.msk.bf16.mxu0 %vm2069_vm0, %v2068_v5 }
 0x284   :  { %1820 = vmatmul.mubr.msk.bf16.vlgmr.msra.gmra.mxu1 %vm243_vm1, %v2246_v61 }
 0x285   :  { %1831 = vmatprep.mubr.msk.bf16.mxu1 %vm2069_vm0, %v2068_v5 }
 0x2bb   :  { %v284_v16 = vpop.f32.mrf.mxu1 }
 0x2bc   :  { %v633_v18 = vmul.f32 0.17677669, %v284_v16 }
 0x2bd   :  { %v1779_v19 = vpop.f32.mrf.mxu1 }
 0x2be   :  { %v2299_v20 = vadd.f32 %v641_v17, %v633_v18 }
 0x2bf   :  { %v287_v21 = vpop.f32.mrf.mxu1 }
 0x2c0   :  { %v650_v22 = vsel %vm243_vm1, %v2299_v20, -inf }
 0x2c1   :  { %v1780_v23 = vpop.f32.mrf.mxu1  ;;  %651 = vmax.xlane.f32.xlu0 %v650_v22 }
 0x2c7   :  { %v333_v24 = vpop.f32.mrf.mxu1 }
 0x2c8   :  { %v634_v25 = vmul.f32 0.17677669, %v333_v24 }
 0x2c9   :  { %v1785_v26 = vpop.f32.mrf.mxu1 }
 0x2ca   :  { %v2303_v27 = vadd.f32 %v641_v17, %v634_v25 }
 0x2cb   :  { %v336_v28 = vpop.f32.mrf.mxu1 }
 0x2cc   :  { %v653_v29 = vsel %vm243_vm1, %v2303_v27, -inf }
 0x2cd   :  { %654 = vmax.xlane.f32.xlu1 %v653_v29  ;;  %v1786_v30 = vpop.f32.mrf.mxu1 }
 0x2de   :  { %795 = vrot.lane.b32.xlu1 %v2220_v46, %s2066_s28 }
 0x2e2   :  { %843 = vrot.lane.b32.xlu1 %v2224_v48, %s2066_s28 }
 0x32c   :  { %v382_v31 = vpop.f32.mrf.mxu1 }
 0x32d   :  { %v635_v32 = vmul.f32 0.17677669, %v382_v31 }
 0x32e   :  { %v1791_v33 = vpop.f32.mrf.mxu1 }
 0x32f   :  { %v2311_v34 = vadd.f32 %v641_v17, %v635_v32 }
 0x330   :  { %v385_v35 = vpop.f32.mrf.mxu1 }
 0x331   :  { %v656_v36 = vsel %vm243_vm1, %v2311_v34, -inf }
 0x332   :  { %657 = vmax.xlane.f32.xlu0 %v656_v36  ;;  %v1792_v37 = vpop.f32.mrf.mxu1 }
 0x334   :  { %v431_v38 = vpop.f32.mrf.mxu1 }
 0x335   :  { %v636_v41 = vmul.f32 0.17677669, %v431_v38 }
 0x336   :  { %v1797_v39 = vpop.f32.mrf.mxu1  ;;  %v480_v40 = vpop.f32.mrf.mxu0 }
 0x337   :  { %v637_v43 = vmul.f32 0.17677669, %v480_v40  ;;  %v645_v50 = vadd.f32 %v641_v17, %v636_v41 }
 0x338   :  { %v434_v44 = vpop.f32.mrf.mxu1  ;;  %v1803_v45 = vpop.f32.mrf.mxu0 }
 0x339   :  { %v2315_v46 = vadd.f32 %v641_v17, %v637_v43  ;;  %v659_v60 = vsel %vm243_vm1, %v645_v50, -inf }
 0x33a   :  { %v1798_v47 = vpop.f32.mrf.mxu1  ;;  %v483_v48 = vpop.f32.mrf.mxu0 }
 0x33b   :  { %v662_v49 = vsel %vm243_vm1, %v2315_v46, -inf }
 0x33c   :  { %v529_v52 = vpop.f32.mrf.mxu1  ;;  %663 = vmax.xlane.f32.xlu0 %v662_v49  ;;  %v1804_v53 = vpop.f32.mrf.mxu0 }
 0x33d   :  { %v638_v54 = vmul.f32 0.17677669, %v529_v52 }
 0x33e   :  { %v1809_v55 = vpop.f32.mrf.mxu1  ;;  %v578_v58 = vpop.f32.mrf.mxu0 }
 0x33f   :  { %v639_v59 = vmul.f32 0.17677669, %v578_v58  ;;  %v647_v63 = vadd.f32 %v641_v17, %v638_v54 }
 0x340   :  { %v532_v2 = vpop.f32.mrf.mxu1  ;;  %660 = vmax.xlane.f32.xlu0 %v659_v60  ;;  %v1815_v3 = vpop.f32.mrf.mxu0 }
 0x341   :  { %v665_v4 = vsel %vm243_vm1, %v647_v63, -inf  ;;  %v2321_v6 = vadd.f32 %v641_v17, %v639_v59 }
 0x342   :  { %666 = vmax.xlane.f32.xlu1 %v665_v4  ;;  %v1810_v7 = vpop.f32.mrf.mxu1  ;;  %v581_v8 = vpop.f32.mrf.mxu0 }
 0x343   :  { %v668_v9 = vsel %vm243_vm1, %v2321_v6, -inf }
 0x344   :  { %v627_v10 = vpop.f32.mrf.mxu1  ;;  %669 = vmax.xlane.f32.xlu0 %v668_v9  ;;  %v1816_v11 = vpop.f32.mrf.mxu0 }
 0x345   :  { %v640_v12 = vmul.f32 0.17677669, %v627_v10 }
 0x346   :  { %v1821_v13 = vpop.f32.mrf.mxu1 }
 0x347   :  { %v649_v14 = vadd.f32 %v641_v17, %v640_v12 }
 0x348   :  { %v630_v15 = vpop.f32.mrf.mxu1 }
 0x349   :  { %v671_v16 = vsel %vm243_vm1, %v649_v14, -inf }
 0x34a   :  { %672 = vmax.xlane.f32.xlu1 %v671_v16  ;;  %v1822_v18 = vpop.f32.mrf.mxu1  ;;  %v652_v23 = vpop.xlane.xlu0 %651 }
 0x34b   :  { %v674_v17 = vsub.f32 %v2299_v20, %v652_v23 }
 0x34d   :  { %v682_v24 = vmul.f32 1.442695, %v674_v17 }
 0x34f   :  { %1985 = vpow2.f32 %v682_v24 }
 0x356   :  { %v655_v19 = vpop.xlane.xlu1 %654 }
 0x357   :  { %v675_v25 = vsub.f32 %v2303_v27, %v655_v19 }
 0x359   :  { %v684_v26 = vmul.f32 1.442695, %v675_v25 }
 0x35a   :  { %v796_v21 = vpop.permute.xlu1 %795  ;;  %746 = vrot.lane.b32.xlu0 %v2216_v42, %s2066_s28 }
 0x35b   :  { %v801_v22 = vsel %vm751_vm2, %v796_v21, 0  ;;  %891 = vrot.lane.b32.xlu1 %v2228_v51, %s2066_s28  ;;  %1987 = vpow2.f32 %v684_v26 }
 0x35c   :  { %1830 = vmatpush3.bf16.msra.mxu1 %v801_v22  ;;  %v1986_v28 = vpop.eup %1985 }
 0x35d   :  { %1841 = vmatprep.subr.bf16.mxu1 %v2068_v5  ;;  %v698_v42 = vsel %vm243_vm1, %v1986_v28, 0.0 }
 0x35e   :  { %v844_v32 = vpop.permute.xlu1 %843 }
 0x35f   :  { %v849_v9 = vsel %vm751_vm2, %v844_v32, 0 }
 0x368   :  { %v2335_v29 = vpop.eup %1987 }
 0x369   :  { %v701_v51 = vsel %vm243_vm1, %v2335_v29, 0.0 }
 0x379   :  { %699 = vadd.xlane.f32.xlu0 %v698_v42 }
 0x37f   :  { %702 = vadd.xlane.f32.xlu1 %v701_v51 }
 0x390   :  { %987 = vrot.lane.b32.xlu1 %v2234_v56, %s2066_s28 }
 0x3bb   :  { %v658_v20 = vpop.xlane.xlu0 %657 }
 0x3bc   :  { %v676_v30 = vsub.f32 %v2311_v34, %v658_v20 }
 0x3be   :  { %v686_v27 = vmul.f32 1.442695, %v676_v30 }
 0x3c0   :  { %1989 = vpow2.f32 %v686_v27 }
 0x3c5   :  { %v664_v31 = vpop.xlane.xlu0 %663 }
 0x3c6   :  { %v678_v55 = vsub.f32 %v2315_v46, %v664_v31 }
 0x3c8   :  { %v690_v58 = vmul.f32 1.442695, %v678_v55 }
 0x3c9   :  { %v661_v33 = vpop.xlane.xlu0 %660 }
 0x3ca   :  { %v677_v35 = vsub.f32 %v645_v50, %v661_v33 }
 0x3cb   :  { %v667_v36 = vpop.xlane.xlu1 %666 }
 0x3cc   :  { %v688_v37 = vmul.f32 1.442695, %v677_v35  ;;  %v679_v38 = vsub.f32 %v647_v63, %v667_v36 }
 0x3cd   :  { %v2342_v39 = vpop.eup %1989  ;;  %v670_v40 = vpop.xlane.xlu0 %669 }
 0x3ce   :  { %1991 = vpow2.f32 %v688_v37  ;;  %v692_v41 = vmul.f32 1.442695, %v679_v38  ;;  %v704_v56 = vsel %vm243_vm1, %v2342_v39, 0.0  ;;  %v680_v59 = vsub.f32 %v2321_v6, %v670_v40 }
 0x3cf   :  { %705 = vadd.xlane.f32.xlu0 %v704_v56 }
 0x3d0   :  { %1993 = vpow2.f32 %v692_v41  ;;  %v694_v60 = vmul.f32 1.442695, %v680_v59  ;;  %v1137_v59 = vld [vmem:[%s2526_s3 + $0x8] sm:$0xf] }
 0x3d1   :  { %v747_v34 = vpop.permute.xlu0 %746 }
 0x3d2   :  { %v753_v43 = vsel %vm751_vm2, %v747_v34, 0  ;;  %v1135_v34 = vld [vmem:[%s2526_s3] sm:$0xf] }
 0x3d3   :  { %v673_v44 = vpop.xlane.xlu1 %672  ;;  %1824 = vmatpush3.bf16.msra.mxu0 %v753_v43 }
 0x3d4   :  { %v681_v45 = vsub.f32 %v649_v14, %v673_v44  ;;  %1835 = vmatprep.subr.bf16.mxu0 %v2068_v5  ;;  %v1143_v44 = vsel %vm751_vm2, %v1135_v34, 0 }
 0x3d6   :  { %v696_v47 = vmul.f32 1.442695, %v681_v45  ;;  %v1136_v45 = vld [vmem:[%s2526_s3 + $0x4] sm:$0xf] }
 0x3d7   :  { %v892_v4 = vpop.permute.xlu1 %891 }
 0x3d8   :  { %1995 = vpow2.f32 %v696_v47  ;;  %v897_v13 = vsel %vm751_vm2, %v892_v4, 0  ;;  %v1190_v47 = vsel %vm751_vm2, %v1136_v45, 0 }
 0x3d9   :  { %1997 = vpow2.f32 %v690_v58 }
 0x3da   :  { %1999 = vpow2.f32 %v694_v60  ;;  %v1237_v60 = vsel %vm751_vm2, %v1137_v59, 0  ;;  %v1967_v59 = vld [vmem:[%s2528_s5 + $0x28] sm:$0xff]  }
 0x3db   :  { %v2348_v48 = vpop.eup %1991 }
 0x3dc   :  { %v707_v49 = vsel %vm243_vm1, %v2348_v48, 0.0 }
 0x3dd   :  { %v2352_v50 = vpop.eup %1993  ;;  %708 = vadd.xlane.f32.xlu1 %v707_v49 }
 0x3de   :  { %v713_v52 = vsel %vm243_vm1, %v2352_v50, 0.0 }
 0x3e1   :  { %714 = vadd.xlane.f32.xlu1 %v713_v52 }
 0x3e5   :  { %v2356_v53 = vpop.eup %1995  ;;  %939 = vrot.lane.b32.xlu0 %v2236_v57, %s2066_s28 }
 0x3e6   :  { %v719_v54 = vsel %vm243_vm1, %v2356_v53, 0.0  ;;  %v2366_v63 = vpop.eup %1997 }
 0x3e7   :  { %720 = vadd.xlane.f32.xlu1 %v719_v54  ;;  %v710_v57 = vsel %vm243_vm1, %v2366_v63, 0.0  ;;  %v2370_v3 = vpop.eup %1999 }
 0x3e8   :  { %v716_v46 = vsel %vm243_vm1, %v2370_v3, 0.0 }
 0x3f8   :  { %1083 = vrot.lane.b32.xlu1 %v2246_v61, %s2066_s28 }
 0x402   :  { %v700_v2 = vpop.xlane.xlu0 %699 }
 0x403   :  { %2001 = vrcp.f32 %v700_v2 }
 0x404   :  { %711 = vadd.xlane.f32.xlu0 %v710_v57 }
 0x408   :  { %v703_v6 = vpop.xlane.xlu1 %702  ;;  %717 = vadd.xlane.f32.xlu0 %v716_v46  ;;  %v1138_v46 = vld [vmem:[%s2526_s3 + $0xc] sm:$0xf] }
 0x409   :  { %2003 = vrcp.f32 %v703_v6 }
 0x40c   :  { %v988_v15 = vpop.permute.xlu1 %987 }
 0x40d   :  { %v993_v42 = vsel %vm751_vm2, %v988_v15, 0 }
 0x410   :  { %v2002_v7 = vpop.eup %2001 }
 0x411   :  { %v730_v8 = vmul.f32 %v2002_v7, %v1986_v28 }
 0x413   :  { %v738_v61 = vpack.c.bf16 %v730_v8, %v730_v8  ;;  %v1284_v8 = vsel %vm751_vm2, %v1138_v46, 0  ;;  %v1974_v46 = vld [vmem:[#allocation2 + $0x30] sm:$0xff]  }
 0x415   :  { %1826 = vmatmul.mubr.msk.bf16.vlgmr.msra.gmra.mxu0 %vm243_vm1, %v738_v61 }
 0x416   :  { %v2004_v10 = vpop.eup %2003  ;;  %1836 = vmatpush3.bf16.msra.mxu0 %v849_v9  ;;  %1837 = vmatprep.mubr.msk.bf16.mxu0 %vm2069_vm0, %v2068_v5 }
 0x417   :  { %v731_v11 = vmul.f32 %v2004_v10, %v2335_v29  ;;  %1847 = vmatprep.subr.bf16.mxu0 %v2068_v5 }
 0x419   :  { %v739_v12 = vpack.c.bf16 %v731_v11, %v731_v11 }
 0x41b   :  { %1832 = vmatmul.mubr.msk.bf16.vlgmr.msra.gmra.mxu1 %vm243_vm1, %v739_v12 }
 0x41c   :  { %1842 = vmatpush3.bf16.msra.mxu1 %v897_v13  ;;  %1843 = vmatprep.mubr.msk.bf16.mxu1 %vm2069_vm0, %v2068_v5 }
 0x41d   :  { %1853 = vmatprep.subr.bf16.mxu1 %v2068_v5 }
 0x41e   :  { %1035 = vrot.lane.b32.xlu0 %v2248_v62, %s2066_s28 }
 0x458   :  { %v706_v14 = vpop.xlane.xlu0 %705 }
 0x459   :  { %2005 = vrcp.f32 %v706_v14 }
 0x45c   :  { %v940_v21 = vpop.permute.xlu0 %939 }
 0x45d   :  { %v945_v17 = vsel %vm751_vm2, %v940_v21, 0 }
 0x466   :  { %v2006_v16 = vpop.eup %2005  ;;  %v709_v18 = vpop.xlane.xlu1 %708 }
 0x467   :  { %2007 = vrcp.f32 %v709_v18  ;;  %v732_v19 = vmul.f32 %v2006_v16, %v2342_v39 }
 0x469   :  { %v740_v22 = vpack.c.bf16 %v732_v19, %v732_v19 }
 0x46a   :  { %v715_v23 = vpop.xlane.xlu1 %714 }
 0x46b   :  { %2009 = vrcp.f32 %v715_v23  ;;  %1838 = vmatmul.mubr.msk.bf16.vlgmr.msra.gmra.mxu0 %vm243_vm1, %v740_v22 }
 0x46c   :  { %1848 = vmatpush3.bf16.msra.mxu0 %v945_v17  ;;  %1849 = vmatprep.mubr.msk.bf16.mxu0 %vm2069_vm0, %v2068_v5 }
 0x46d   :  { %1859 = vmatprep.subr.bf16.mxu0 %v2068_v5 }
 0x470   :  { %v721_v62 = vpop.xlane.xlu1 %720 }
 0x471   :  { %2011 = vrcp.f32 %v721_v62 }
 0x474   :  { %v2008_v24 = vpop.eup %2007  ;;  %v1084_v51 = vpop.permute.xlu1 %1083 }
 0x475   :  { %v733_v25 = vmul.f32 %v2008_v24, %v2348_v48  ;;  %v1089_v27 = vsel %vm751_vm2, %v1084_v51, 0 }
 0x477   :  { %v741_v26 = vpack.c.bf16 %v733_v25, %v733_v25 }
 0x478   :  { %v2010_v28 = vpop.eup %2009 }
 0x479   :  { %1844 = vmatmul.mubr.msk.bf16.vlgmr.msra.gmra.mxu1 %vm243_vm1, %v741_v26  ;;  %v735_v29 = vmul.f32 %v2010_v28, %v2352_v50 }
 0x47a   :  { %1854 = vmatpush3.bf16.msra.mxu1 %v993_v42  ;;  %1855 = vmatprep.mubr.msk.bf16.mxu1 %vm2069_vm0, %v2068_v5 }
 0x47b   :  { %1865 = vmatprep.subr.bf16.mxu1 %v2068_v5  ;;  %v743_v20 = vpack.c.bf16 %v735_v29, %v735_v29 }
 0x47e   :  { %v2012_v30 = vpop.eup %2011 }
 0x47f   :  { %v737_v31 = vmul.f32 %v2012_v30, %v2356_v53 }
 0x481   :  { %1856 = vmatmul.mubr.msk.bf16.vlgmr.msra.gmra.mxu1 %vm243_vm1, %v743_v20  ;;  %v745_v32 = vpack.c.bf16 %v737_v31, %v737_v31 }
 0x482   :  { %1866 = vmatpush3.bf16.msra.mxu1 %v1089_v27  ;;  %1867 = vmatprep.mubr.msk.bf16.mxu1 %vm2069_vm0, %v2068_v5 }
 0x483   :  { %1877 = vmatprep.subr.bf16.mxu1 %v2068_v5 }
 0x489   :  { %1868 = vmatmul.mubr.msk.bf16.vlgmr.msra.gmra.mxu1 %vm243_vm1, %v745_v32 }
 0x48a   :  { %1879 = vmatprep.mubr.msk.bf16.mxu1 %vm2069_vm0, %v2068_v5  ;;  %1878 = vmatpush3.bf16.msra.mxu1 %v1190_v47 }
 0x48b   :  { %1889 = vmatprep.subr.bf16.mxu1 %v2068_v5 }
 0x48d   :  { %v712_v33 = vpop.xlane.xlu0 %711 }
 0x48e   :  { %2013 = vrcp.f32 %v712_v33 }
 0x491   :  { %v718_v35 = vpop.xlane.xlu0 %717 }
 0x492   :  { %2015 = vrcp.f32 %v718_v35 }
 0x495   :  { %v1036_v38 = vpop.permute.xlu0 %1035 }
 0x496   :  { %v1041_v41 = vsel %vm751_vm2, %v1036_v38, 0 }
 0x49b   :  { %v2014_v36 = vpop.eup %2013 }
 0x49c   :  { %v734_v37 = vmul.f32 %v2014_v36, %v2366_v63 }
 0x49e   :  { %v742_v39 = vpack.c.bf16 %v734_v37, %v734_v37 }
 0x49f   :  { %v2016_v40 = vpop.eup %2015 }
 0x4a0   :  { %1850 = vmatmul.mubr.msk.bf16.vlgmr.msra.gmra.mxu0 %vm243_vm1, %v742_v39  ;;  %v736_v56 = vmul.f32 %v2016_v40, %v2370_v3 }
 0x4a1   :  { %1860 = vmatpush3.bf16.msra.mxu0 %v1041_v41  ;;  %1861 = vmatprep.mubr.msk.bf16.mxu0 %vm2069_vm0, %v2068_v5 }
 0x4a2   :  { %1871 = vmatprep.subr.bf16.mxu0 %v2068_v5  ;;  %v744_v43 = vpack.c.bf16 %v736_v56, %v736_v56  ;;  %v1667_v56 = vld [vmem:[%s2527_s4] ss:$0 sm:$0xff] }
 0x4a8   :  { %1862 = vmatmul.mubr.msk.bf16.vlgmr.msra.gmra.mxu0 %vm243_vm1, %v744_v43 }
 0x4a9   :  { %1872 = vmatpush3.bf16.msra.mxu0 %v1143_v44  ;;  %1873 = vmatprep.mubr.msk.bf16.mxu0 %vm2069_vm0, %v2068_v5 }
 0x4aa   :  { %1883 = vmatprep.subr.bf16.mxu0 %v2068_v5 }
 0x4d5   :  { %v789_v48 = vpop.f32.mrf.mxu0 }
 0x4d7   :  { %v1827_v49 = vpop.f32.mrf.mxu0 }
 0x4d9   :  { %v792_v50 = vpop.f32.mrf.mxu0 }
 0x4db   :  { %v1828_v52 = vpop.f32.mrf.mxu0  ;;  %v837_v53 = vpop.f32.mrf.mxu1 }
 0x4dc   :  { %v1131_v54 = vpack.c.bf16 %v837_v53, %v789_v48 }
 0x4dd   :  { %v1833_v55 = vpop.f32.mrf.mxu1 }
 0x4de   :  { %1874 = vmatmul.mubr.msk.bf16.vlgmr.msra.gmra.mxu0 %vm243_vm1, %v1131_v54 }
 0x4df   :  { %v840_v58 = vpop.f32.mrf.mxu1  ;;  %1885 = vmatprep.mubr.msk.bf16.mxu0 %vm2069_vm0, %v2068_v5  ;;  %1884 = vmatpush3.bf16.msra.mxu0 %v1237_v60  ;;  %v1968_v60 = vld [vmem:[%s2528_s5 + $0x20] sm:$0xff]  }
 0x4e0   :  { %1895 = vmatprep.subr.bf16.mxu0 %v2068_v5 }
 0x4e1   :  { %v1834_v63 = vpop.f32.mrf.mxu1 }
 0x4e2   :  { %v1969_v63 = vld [vmem:[%s2528_s5 + $0x18] sm:$0xff]  }
 0x52b   :  { %v885_v2 = vpop.f32.mrf.mxu0 }
 0x52d   :  { %v1839_v57 = vpop.f32.mrf.mxu0 }
 0x52e   :  { %v1971_v57 = vld [vmem:[%s2528_s5 + $0x8] sm:$0xff]  }
 0x52f   :  { %v888_v3 = vpop.f32.mrf.mxu0 }
 0x530   :  { %v1972_v3 = vld [vmem:[%s2528_s5] sm:$0xff]  }
 0x531   :  { %v1840_v4 = vpop.f32.mrf.mxu0 }
 0x532   :  { %v1973_v4 = vld [vmem:[#allocation2 + $0x38] sm:$0xff]  }
 0x539   :  { %v933_v6 = vpop.f32.mrf.mxu1 }
 0x53a   :  { %v1132_v7 = vpack.c.bf16 %v933_v6, %v885_v2  ;;  %v1970_v2 = vld [vmem:[%s2528_s5 + $0x10] sm:$0xff]   ;;  %v1975_v6 = vld [vmem:[#allocation2 + $0x28] sm:$0xff]  }
 0x53b   :  { %v1845_v61 = vpop.f32.mrf.mxu1 }
 0x53c   :  { %1880 = vmatmul.mubr.msk.bf16.vlgmr.msra.gmra.mxu1 %vm243_vm1, %v1132_v7  ;;  %v1976_v7 = vld [vmem:[#allocation2 + $0x20] sm:$0xff]  }
 0x53d   :  { %v936_v9 = vpop.f32.mrf.mxu1  ;;  %1890 = vmatpush3.bf16.msra.mxu1 %v1284_v8  ;;  %1891 = vmatprep.mubr.msk.bf16.mxu1 %vm2069_vm0, %v2068_v5  ;;  %v1977_v8 = vld [vmem:[#allocation2 + $0x18] sm:$0xff]  }
 0x53e   :  { %1915 = vmatprep.subr.bf16.mxu1 %v2068_v5 }
 0x53f   :  { %v1846_v10 = vpop.f32.mrf.mxu1 }
 0x541   :  { %v1029_v11 = vpop.f32.mrf.mxu1 }
 0x543   :  { %v1857_v12 = vpop.f32.mrf.mxu1 }
 0x545   :  { %v1032_v13 = vpop.f32.mrf.mxu1 }
 0x547   :  { %v1858_v14 = vpop.f32.mrf.mxu1 }
 0x549   :  { %v1125_v15 = vpop.f32.mrf.mxu1 }
 0x54b   :  { %v1869_v16 = vpop.f32.mrf.mxu1 }
 0x54d   :  { %v1128_v18 = vpop.f32.mrf.mxu1 }
 0x54f   :  { %v1870_v19 = vpop.f32.mrf.mxu1 }
 0x560   :  { %v981_v21 = vpop.f32.mrf.mxu0 }
 0x561   :  { %v1133_v22 = vpack.c.bf16 %v1029_v11, %v981_v21 }
 0x562   :  { %v1851_v23 = vpop.f32.mrf.mxu0 }
 0x563   :  { %1886 = vmatmul.mubr.msk.bf16.vlgmr.msra.gmra.mxu0 %vm243_vm1, %v1133_v22 }
 0x564   :  { %v984_v17 = vpop.f32.mrf.mxu0  ;;  %1911 = vmatprep.mubr.msk.bf16.mxu0 %vm2069_vm0, %v2068_v5 }
 0x566   :  { %v1852_v62 = vpop.f32.mrf.mxu0 }
 0x568   :  { %v1077_v24 = vpop.f32.mrf.mxu0 }
 0x569   :  { %v1134_v25 = vpack.c.bf16 %v1125_v15, %v1077_v24 }
 0x56a   :  { %v1863_v26 = vpop.f32.mrf.mxu0 }
 0x56b   :  { %1892 = vmatmul.mubr.msk.bf16.vlgmr.msra.gmra.mxu1 %vm243_vm1, %v1134_v25  ;;  %v1668_v25 = vld [vmem:[%s2534_s11] ss:$0 sm:$0xff] }
 0x56c   :  { %v1080_v28 = vpop.f32.mrf.mxu0  ;;  %1931 = vmatprep.mubr.msk.bf16.mxu1 %vm2069_vm0, %v2068_v5  ;;  %1916 = vmatpush3.bf16.msra.mxu1 %v1973_v4 }
 0x56d   :  { %1917 = vmatprep.subr.bf16.mxu1 %v2068_v5 }
 0x56e   :  { %v1864_v42 = vpop.f32.mrf.mxu0 }
 0x570   :  { %1918 = vmatpush3.bf16.msra.mxu1 %v1974_v46 }
 0x571   :  { %1919 = vmatprep.subr.bf16.mxu1 %v2068_v5 }
 0x574   :  { %1920 = vmatpush3.bf16.msra.mxu1 %v1975_v6 }
 0x575   :  { %1921 = vmatprep.subr.bf16.mxu1 %v2068_v5 }
 0x578   :  { %1922 = vmatpush3.bf16.msra.mxu1 %v1976_v7 }
 0x579   :  { %1923 = vmatprep.subr.bf16.mxu1 %v2068_v5 }
 0x57c   :  { %1924 = vmatpush3.bf16.msra.mxu1 %v1977_v8 }
 0x57d   :  { %1925 = vmatprep.subr.bf16.mxu1 %v2068_v5 }
 0x59e   :  { %v1179_v29 = vpop.f32.mrf.mxu0 }
 0x5a0   :  { %v1875_v51 = vpop.f32.mrf.mxu0 }
 0x5a1   :  { %v1669_v51 = vld [vmem:[%s2535_s12] ss:$0 sm:$0xff] }
 0x5a2   :  { %v1182_v20 = vpop.f32.mrf.mxu0 }
 0x5a4   :  { %v1876_v30 = vpop.f32.mrf.mxu0 }
 0x5fc   :  { %v1226_v27 = vpop.f32.mrf.mxu1 }
 0x5fd   :  { %v1327_v38 = vadd.f32 %v1226_v27, %v1179_v29 }
 0x5fe   :  { %v1881_v31 = vpop.f32.mrf.mxu1 }
 0x600   :  { %v1229_v32 = vpop.f32.mrf.mxu1 }
 0x601   :  { %v1330_v34 = vadd.f32 %v1229_v32, %v1182_v20  ;;  %v1978_v32 = vld [vmem:[#allocation2 + $0x10] sm:$0xff]  }
 0x602   :  { %v1882_v33 = vpop.f32.mrf.mxu1  ;;  %1926 = vmatpush3.bf16.msra.mxu1 %v1978_v32 }
 0x603   :  { %1927 = vmatprep.subr.bf16.mxu1 %v2068_v5  ;;  %v1979_v33 = vld [vmem:[#allocation2 + $0x8] sm:$0xff]  }
 0x606   :  { %1928 = vmatpush3.bf16.msra.mxu1 %v1979_v33 }
 0x607   :  { %1929 = vmatprep.subr.bf16.mxu1 %v2068_v5 }
 0x623   :  { %v1273_v35 = vpop.f32.mrf.mxu0 }
 0x624   :  { %v1328_v40 = vadd.f32 %v1327_v38, %v1273_v35  ;;  %v1980_v35 = vld [vmem:[#allocation2] sm:$0xff]  }
 0x625   :  { %v1887_v36 = vpop.f32.mrf.mxu0  ;;  %1930 = vmatpush3.bf16.msra.mxu1 %v1980_v35 }
 0x626   :  { %v1670_v36 = vld [vmem:[%s2529_s6] ss:$0 sm:$0xff]  ;;  %s2074_s6 = smov [#allocation5]  }
 0x627   :  { %v1276_v37 = vpop.f32.mrf.mxu0  ;;  %s1625_s26 = sshll.u32 %s2074_s6, 4  ;;  %s1626_s26 = int_to_ptr.vmem [resolvable:$true] %s1625_s26 }
 0x628   :  { %v1331_v45 = vadd.f32 %v1330_v34, %v1276_v37  ;;  %s2041_s27 = scalar_lea.vmem %s1626_s26, 256  ;;  %p2046_p6 = scmp.lt.s32.totalorder %s1626_s26, %s1626_s26 }
 0x629   :  { %v1888_v39 = vpop.f32.mrf.mxu0  ;;  %p2042_p5 = scmp.ne.s32.totalorder %s1626_s26, %s2041_s27  ;;  %p2047_p7 = scmp.lt.s32.totalorder %s2041_s27, %s2041_s27 }
 0x62b   :  { %v1320_v41 = vpop.f32.mrf.mxu1  ;;  %p2048_p8 = por %p2047_p7, %p2046_p6 }
 0x62c   :  { %v1329_v43 = vadd.f32 %v1328_v40, %v1320_v41 }
 0x62d   :  { %v1893_v44 = vpop.f32.mrf.mxu1  ;;  %p2049_p9 = pnand %p2048_p8, %p2042_p5 }
 0x62e   :  { %v1340_v47 = vadd.f32 %v1667_v56, %v1329_v43 }
 0x62f   :  { %v1323_v48 = vpop.f32.mrf.mxu1 }
 0x630   :  { %v2455_v49 = vadd.f32 %v1340_v47, %v2155_v0  ;;  %v1332_v50 = vadd.f32 %v1331_v45, %v1323_v48  ;;  %v1965_v0 = vld [vmem:[%s2528_s5 + $0x38] sm:$0xff]  }
 0x631   :  { %v1894_v52 = vpop.f32.mrf.mxu1  ;;  %1896 = vmatpush3.bf16.msra.mxu0 %v1965_v0 }
 0x632   :  { %v1341_v53 = vadd.f32 %v1667_v56, %v1332_v50  ;;  %1346 = vadd.xlane.f32.xlu0 %v2455_v49  ;;  %v1352_v55 = vmul.f32 %v2455_v49, %v2455_v49  ;;  %1897 = vmatprep.subr.bf16.mxu0 %v2068_v5 }
 0x634   :  { %v2459_v54 = vadd.f32 %v1341_v53, %v2160_v1  ;;  %v1966_v1 = vld [vmem:[%s2528_s5 + $0x30] sm:$0xff]  }
 0x635   :  { %1898 = vmatpush3.bf16.msra.mxu0 %v1966_v1 }
 0x636   :  { %1354 = vadd.xlane.f32.xlu0 %v1352_v55  ;;  %1348 = vadd.xlane.f32.xlu1 %v2459_v54  ;;  %v1353_v58 = vmul.f32 %v2459_v54, %v2459_v54 }
 0x637   :  { %1899 = vmatprep.subr.bf16.mxu0 %v2068_v5 }
 0x639   :  { %1900 = vmatpush3.bf16.msra.mxu0 %v1967_v59 }
 0x63a   :  { %1356 = vadd.xlane.f32.xlu0 %v1353_v58  ;;  %1901 = vmatprep.subr.bf16.mxu0 %v2068_v5 }
 0x63d   :  { %1902 = vmatpush3.bf16.msra.mxu0 %v1968_v60 }
 0x63e   :  { %1903 = vmatprep.subr.bf16.mxu0 %v2068_v5 }
 0x641   :  { %1904 = vmatpush3.bf16.msra.mxu0 %v1969_v63 }
 0x642   :  { %1905 = vmatprep.subr.bf16.mxu0 %v2068_v5 }
 0x645   :  { %1906 = vmatpush3.bf16.msra.mxu0 %v1970_v2 }
 0x646   :  { %1907 = vmatprep.subr.bf16.mxu0 %v2068_v5 }
 0x649   :  { %1908 = vmatpush3.bf16.msra.mxu0 %v1971_v57 }
 0x64a   :  { %1909 = vmatprep.subr.bf16.mxu0 %v2068_v5  ;;  %v1679_v5 = vld [vmem:[%s2531_s8] ss:$0 sm:$0xff] }
 0x64d   :  { %1910 = vmatpush3.bf16.msra.mxu0 %v1972_v3 }
 0x6bb   :  { %v1347_v61 = vpop.xlane.xlu0 %1346 }
 0x6bc   :  { %v1350_v9 = vmul.f32 0.03125, %v1347_v61 }
 0x6be   :  { %v1360_v12 = vmul.f32 %v1350_v9, %v1350_v9  ;;  %v1364_v17 = vsub.f32 %v2455_v49, %v1350_v9 }
 0x6bf   :  { %v1355_v10 = vpop.xlane.xlu0 %1354  ;;  %v1349_v11 = vpop.xlane.xlu1 %1348 }
 0x6c0   :  { %v1358_v13 = vmul.f32 0.03125, %v1355_v10  ;;  %v1351_v14 = vmul.f32 0.03125, %v1349_v11 }
 0x6c2   :  { %v1362_v15 = vsub.f32 %v1358_v13, %v1360_v12  ;;  %v1361_v19 = vmul.f32 %v1351_v14, %v1351_v14  ;;  %v1365_v26 = vsub.f32 %v2459_v54, %v1351_v14 }
 0x6c3   :  { %v1357_v16 = vpop.xlane.xlu0 %1356 }
 0x6c4   :  { %v1366_v18 = vadd.f32 1e-05, %v1362_v15  ;;  %v1359_v21 = vmul.f32 0.03125, %v1357_v16 }
 0x6c6   :  { %2017 = vrsqrt.f32 %v1366_v18  ;;  %v1363_v22 = vsub.f32 %v1359_v21, %v1361_v19 }
 0x6c8   :  { %v1367_v23 = vadd.f32 1e-05, %v1363_v22 }
 0x6ca   :  { %2019 = vrsqrt.f32 %v1367_v23 }
 0x6d3   :  { %v2018_v62 = vpop.eup %2017 }
 0x6d4   :  { %v1370_v24 = vmul.f32 %v2018_v62, %v1364_v17 }
 0x6d6   :  { %v1378_v29 = vmul.f32 %v1668_v25, %v1370_v24 }
 0x6d7   :  { %v2020_v28 = vpop.eup %2019 }
 0x6d8   :  { %v1371_v42 = vmul.f32 %v2020_v28, %v1365_v26  ;;  %v1386_v30 = vadd.f32 %v1669_v51, %v1378_v29 }
 0x6da   :  { %v1379_v20 = vmul.f32 %v1668_v25, %v1371_v42 }
 0x6dc   :  { %v1387_v27 = vadd.f32 %v1669_v51, %v1379_v20 }
 0x6de   :  { %v1388_v31 = vpack.c.bf16 %v1387_v27, %v1386_v30 }
 0x6e0   :  { %1912 = vmatmul.mubr.bf16.vlgmr.msra.gmra.mxu0 %v1388_v31 }
 0x7a0   :  { %v1494_v37 = vpop.f32.mrf.mxu0 }
 0x7a1   :  { %v1495_v39 = vadd.f32 %v1670_v36, %v1494_v37 }
 0x7a2   :  { %v1913_v38 = vpop.f32.mrf.mxu0 }
 0x7a3   :  { %v1501_v34 = vmax.f32 %v1495_v39, 0.0 }
 0x7a4   :  { %v1497_v40 = vpop.f32.mrf.mxu0 }
 0x7a5   :  { %v1498_v41 = vadd.f32 %v1670_v36, %v1497_v40 }
 0x7a6   :  { %v1914_v56 = vpop.f32.mrf.mxu0 }
 0x7a7   :  { %v1502_v43 = vmax.f32 %v1498_v41, 0.0 }
 0x7a9   :  { %v1503_v44 = vpack.c.bf16 %v1502_v43, %v1501_v34 }
 0x7ab   :  { %1932 = vmatmul.mubr.bf16.vlgmr.msra.gmra.mxu1 %v1503_v44 }
 0x86b   :  { %v1609_v45 = vpop.f32.mrf.mxu1 }
 0x86c   :  { %v1610_v47 = vadd.f32 %v1679_v5, %v1609_v45 }
 0x86d   :  { %v1933_v48 = vpop.f32.mrf.mxu1 }
 0x86e   :  { %v1616_v50 = vadd.f32 %v1610_v47, %v2455_v49 }
 0x86f   :  { %v1612_v52 = vpop.f32.mrf.mxu1 }
 0x870   :  { %1618 = vst [vmem:[#allocation5] sm:$0xff] %v1616_v50  ;;  %v1613_v53 = vadd.f32 %v1679_v5, %v1612_v52 }
 0x871   :  { %v1934_v55 = vpop.f32.mrf.mxu1 }
 0x872   :  { %v1617_v58 = vadd.f32 %v1613_v53, %v2459_v54 }
 0x874   :  { %1619 = vst [vmem:[#allocation5 + $0x8] sm:$0xff] %v1617_v58 }
 0x875   :  { %2052 = shalt.err (!%p2049_p9)
}
 0x876   :  { %s2075_s8 = smov 128   ;;  %s2076_s3 = smov 8  }
 0x877   :  { %1631 = dma.vmem_to_hbm [thread:$0]  %s1626_s26, 256, %s2536_s13, [#allocation4], %s2075_s8, %s2075_s8, %s2076_s3  }
 0x878   :  { %2063 = dma.done.wait [#allocation4], 256  }
 0x879   :  { %2064 = vsyncadd [#allocation4], 4294967040 }
 0x87a   :  { %1635 = vsyncpa [#allocation3], 1 }
 0x87b   :  { %1636 = vsyncpa [#allocation4], 1 }

</bundles_post_ra>
